<compile_context>
chip_gen: v7x
topology: tpu7x:2x2x1
jax: 0.10.0
libtpu: 0.0.40
codegen_flags: <defaults>
</compile_context>

<pallas_src>
import functools

import numpy as np
import jax
import jax.numpy as jnp
from jax import lax
from jax.experimental import pallas as pl
from jax.experimental.pallas import tpu as pltpu

# bf16 MXU inputs + f32 accumulation (feedback for v6e/v7x). Set to
# jnp.float32 for bit-faithful f32 matmuls.
MXU_DTYPE = jnp.bfloat16

LANE = 128
SUBLANE = 8


def _round_up(n, m):
    return ((n + m - 1) // m) * m


# ----------------------------------------------------------------------------
# Fused kernel: `num_steps` SRGNNCell iterations + gathers + attention readout.
# ----------------------------------------------------------------------------
def _make_srgnn_kernel(num_steps):
    def kernel(a_in_ref, a_out_ref, h0_ref, alias_ref, last_ref,
               w_io_ref, b_io_ref, w_ih_ref, b_ih_ref, w_hh_ref, b_hh_ref,
               w1_ref, b1_ref, w2_ref, b2_ref, w3_ref, wt_ref, bt_ref,
               out_ref):
        Np, Dp = h0_ref.shape
        BL = alias_ref.shape[0]
        B = last_ref.shape[0]
        L = BL // B

        # --- adjacency / weights: loaded & cast once, VMEM-resident for all
        # --- propagation steps (no re-DMA per step).
        a_in = a_in_ref[...].astype(MXU_DTYPE)      # (Np, Np)
        a_out = a_out_ref[...].astype(MXU_DTYPE)    # (Np, Np)
        w_io = w_io_ref[...].astype(MXU_DTYPE)      # (Dp, 2Dp) = [w_in | w_out]
        b_io = b_io_ref[...]                        # (1, 2Dp)
        w_ih = w_ih_ref[...].astype(MXU_DTYPE)      # (2Dp, 3Dp)
        b_ih = b_ih_ref[...]                        # (1, 3Dp)
        w_hh = w_hh_ref[...].astype(MXU_DTYPE)      # (Dp, 3Dp)
        b_hh = b_hh_ref[...]                        # (1, 3Dp)

        # --- SRGNNCell, all steps fused in-kernel -------------------------
        def gnn_step(_, h):
            h_m = h.astype(MXU_DTYPE)
            # fused lin_in / lin_out: one (Dp, 2Dp) matmul, lane-aligned slices
            lin = jnp.dot(h_m, w_io, preferred_element_type=jnp.float32) + b_io
            m_in = jnp.dot(a_in, lin[:, :Dp].astype(MXU_DTYPE),
                           preferred_element_type=jnp.float32)
            m_out = jnp.dot(a_out, lin[:, Dp:].astype(MXU_DTYPE),
                            preferred_element_type=jnp.float32)
            # lin_ih(cat([m_in, m_out])) without materializing the concat
            gi = (jnp.dot(m_in.astype(MXU_DTYPE), w_ih[:Dp],
                          preferred_element_type=jnp.float32)
                  + jnp.dot(m_out.astype(MXU_DTYPE), w_ih[Dp:],
                            preferred_element_type=jnp.float32)
                  + b_ih)
            gh = jnp.dot(h_m, w_hh, preferred_element_type=jnp.float32) + b_hh

            i_r, i_i, i_n = gi[:, :Dp], gi[:, Dp:2 * Dp], gi[:, 2 * Dp:]
            h_r, h_i, h_n = gh[:, :Dp], gh[:, Dp:2 * Dp], gh[:, 2 * Dp:]
            # Gate math in f32 on the VPU/EUP (v5e has no bf16 VPU/EUP).
            reset_gate = jax.nn.sigmoid(i_r + h_r)
            input_gate = jax.nn.sigmoid(i_i + h_i)
            new_gate = jnp.tanh(i_n + reset_gate * h_n)
            # Matches the reference module literally:
            #   hy = (1 - input_gate) * hidden + input_gate * new_gate
            return (1.0 - input_gate) * h + input_gate * new_gate

        hidden = lax.fori_loop(0, num_steps, gnn_step, h0_ref[...],
                               unroll=True)                       # (Np, Dp) f32

        # --- gathers as exact one-hot matmuls (f32; no XLU row gather) ----
        alias = alias_ref[...]                                    # (B*L, 1) i32
        node_ids = lax.broadcasted_iota(jnp.int32, (BL, Np), 1)
        sel_seq = (alias == node_ids).astype(jnp.float32)         # (B*L, Np)
        seq_flat = jnp.dot(sel_seq, hidden,
                           preferred_element_type=jnp.float32)    # (B*L, Dp)

        last = last_ref[...]                                      # (B, 1) i32
        node_ids_b = lax.broadcasted_iota(jnp.int32, (B, Np), 1)
        sel_last = (last == node_ids_b).astype(jnp.float32)       # (B, Np)
        ht = jnp.dot(sel_last, hidden,
                     preferred_element_type=jnp.float32)          # (B, Dp)

        # --- attention readout, all 2-D lane-dense ------------------------
        q1 = jnp.dot(ht.astype(MXU_DTYPE), w1_ref[...].astype(MXU_DTYPE),
                     preferred_element_type=jnp.float32) + b1_ref[...]
        q2 = jnp.dot(seq_flat.astype(MXU_DTYPE), w2_ref[...].astype(MXU_DTYPE),
                     preferred_element_type=jnp.float32) + b2_ref[...]

        # replicate q1 across the L positions of each session with a block
        # indicator matmul (keeps everything (B*L, Dp); no 3-D relayouts)
        jT = lax.broadcasted_iota(jnp.int32, (BL, B), 0)
        bT = lax.broadcasted_iota(jnp.int32, (BL, B), 1)
        rep = ((jT >= bT * L) & (jT < (bT + 1) * L)).astype(jnp.float32)
        q1_rep = jnp.dot(rep, q1, preferred_element_type=jnp.float32)

        s = jax.nn.sigmoid(q1_rep + q2)                           # (B*L, Dp)
        # linear_three (Dp -> 1, no bias) as a lane reduction on the XLU
        alpha = jnp.sum(s * w3_ref[...], axis=-1, keepdims=True)  # (B*L, 1)
        maskf = (alias > 0).astype(jnp.float32)                   # (B*L, 1)
        weighted = seq_flat * (alpha * maskf)                     # (B*L, Dp)

        # per-session sum over L positions, again as an indicator matmul
        jS = lax.broadcasted_iota(jnp.int32, (B, BL), 1)
        bS = lax.broadcasted_iota(jnp.int32, (B, BL), 0)
        pool = ((jS >= bS * L) & (jS < (bS + 1) * L)).astype(jnp.float32)
        a = jnp.dot(pool, weighted, preferred_element_type=jnp.float32)  # (B, Dp)

        # linear_transform(cat([a, ht])) without materializing the concat
        wt = wt_ref[...].astype(MXU_DTYPE)
        out_ref[...] = (
            jnp.dot(a.astype(MXU_DTYPE), wt[:Dp],
                    preferred_element_type=jnp.float32)
            + jnp.dot(ht.astype(MXU_DTYPE), wt[Dp:],
                      preferred_element_type=jnp.float32)
            + bt_ref[...])

    return kernel


# ----------------------------------------------------------------------------
# Lane-dense (block-wise) zero padding of parameters to Dp = 128·k.
# ----------------------------------------------------------------------------
def _pad2(w, rows, cols):
    out = jnp.zeros((rows, cols), w.dtype)
    return out.at[:w.shape[0], :w.shape[1]].set(w)


def _pad_blocked(w, n_row_blk, n_col_blk, D, Dp):
    out = jnp.zeros((n_row_blk * Dp, n_col_blk * Dp), w.dtype)
    for i in range(n_row_blk):
        for j in range(n_col_blk):
            out = out.at[i * Dp:i * Dp + D, j * Dp:j * Dp + D].set(
                w[i * D:(i + 1) * D, j * D:(j + 1) * D])
    return out


def _pad_bias_blocked(b, n_blk, D, Dp):
    out = jnp.zeros((1, n_blk * Dp), b.dtype)
    for j in range(n_blk):
        out = out.at[:, j * Dp:j * Dp + D].set(b[:, j * D:(j + 1) * D])
    return out


def pad_params(params, D, Dp):
    p = {}
    p['item_emb'] = _pad2(params['item_emb'], params['item_emb'].shape[0], Dp)
    w_in = _pad2(params['w_in'], Dp, Dp)
    w_out = _pad2(params['w_out'], Dp, Dp)
    p['w_io'] = jnp.concatenate([w_in, w_out], axis=1)              # (Dp, 2Dp)
    p['b_io'] = jnp.concatenate([_pad2(params['b_in'], 1, Dp),
                                 _pad2(params['b_out'], 1, Dp)], axis=1)
    p['w_ih'] = _pad_blocked(params['w_ih'], 2, 3, D, Dp)           # (2Dp, 3Dp)
    p['b_ih'] = _pad_bias_blocked(params['b_ih'], 3, D, Dp)
    p['w_hh'] = _pad_blocked(params['w_hh'], 1, 3, D, Dp)           # (Dp, 3Dp)
    p['b_hh'] = _pad_bias_blocked(params['b_hh'], 3, D, Dp)
    p['w1'] = _pad2(params['w1'], Dp, Dp)
    p['b1'] = _pad2(params['b1'], 1, Dp)
    p['w2'] = _pad2(params['w2'], Dp, Dp)
    p['b2'] = _pad2(params['b2'], 1, Dp)
    p['w3'] = _pad2(params['w3'], 1, Dp)
    p['wt'] = _pad_blocked(params['wt'], 2, 1, D, Dp)               # (2Dp, Dp)
    p['bt'] = _pad2(params['bt'], 1, Dp)
    return p


# ----------------------------------------------------------------------------
# Wrapper: embedding lookup + dense row-normalized adjacency in XLA, then one
# fused Pallas kernel for everything else.
# ----------------------------------------------------------------------------
def srgnn_forward(params, x, edge_index, alias_inputs, item_seq_len, step):
    D = params['item_emb'].shape[1]
    Dp = _round_up(D, LANE)
    N = x.shape[0]
    Np = _round_up(N, SUBLANE)
    B, L = alias_inputs.shape

    pp = pad_params(params, D, Dp)

    # TODO(synk): for sparse session graphs (E << N^2) replace the dense
    # row-normalized adjacency by an edge-list gather + segment-sum
    # formulation (scalar-prefetched src/dst indices) to avoid O(N^2) work.
    hidden0 = jnp.zeros((Np, Dp), jnp.float32).at[:N].set(pp['item_emb'][x])

    src, dst = edge_index[0], edge_index[1]

    def build_adj(s, d):
        # A[d, s] = edge multiplicity, row-normalized => PyG scatter-mean.
        A = jnp.zeros((Np, Np), jnp.float32).at[d, s].add(1.0)
        deg = jnp.sum(A, axis=1, keepdims=True)
        return A / jnp.maximum(deg, 1.0)

    A_in = build_adj(src, dst)     # aggregate messages h[src] at dst
    A_out = build_adj(dst, src)    # reversed edge direction

    alias_i32 = alias_inputs.astype(jnp.int32)
    alias_col = alias_i32.reshape(B * L, 1)                          # (B*L, 1)
    last_alias = alias_i32[jnp.arange(B), item_seq_len - 1].reshape(B, 1)

    operands = (A_in, A_out, hidden0, alias_col, last_alias,
                pp['w_io'], pp['b_io'], pp['w_ih'], pp['b_ih'],
                pp['w_hh'], pp['b_hh'],
                pp['w1'], pp['b1'], pp['w2'], pp['b2'], pp['w3'],
                pp['wt'], pp['bt'])

    # advisory cost estimate so XLA can schedule around the fused custom call
    gnn_flops = (2 * Np * Dp * (2 * Dp) + 2 * (2 * Np * Np * Dp)
                 + 2 * (2 * Np * Dp * 3 * Dp) + 2 * Np * Dp * 3 * Dp)
    attn_flops = (2 * (B * L) * Np * Dp + 2 * B * Np * Dp
                  + 2 * (B * L + B) * Dp * Dp
                  + 2 * (B * L) * B * Dp * 2 + 2 * 2 * B * Dp * Dp)
    bytes_accessed = sum(int(np.prod(o.shape)) * 4 for o in operands) + B * Dp * 4
    cost = pl.CostEstimate(
        flops=int(step * gnn_flops + attn_flops),
        transcendentals=int(step * 3 * Np * Dp + B * L * Dp),
        bytes_accessed=int(bytes_accessed))

    vmem_spec = pl.BlockSpec(memory_space=pltpu.MemorySpace.VMEM)

    # TODO(synk): for large graphs (e.g. N >= 2048) the fully VMEM-resident
    # dense adjacency exceeds v7x's 64 MiB VMEM; tile the cell over output
    # rows with a ("parallel", ...) grid (one propagation sweep per step) so
    # both v7x TensorCores are used and VMEM stays within budget.
    out_p = pl.pallas_call(
        _make_srgnn_kernel(step),
        out_shape=jax.ShapeDtypeStruct((B, Dp), jnp.float32),
        in_specs=[vmem_spec] * len(operands),
        out_specs=vmem_spec,
        compiler_params=pltpu.CompilerParams(
            vmem_limit_bytes=32 * 1024 * 1024),
        cost_estimate=cost,
    )(*operands)

    return out_p[:, :D]


# ----------------------------------------------------------------------------
# Deterministic parameter init (uniform(-1/sqrt(D), 1/sqrt(D)), as in module).
# ----------------------------------------------------------------------------
def init_params(key, n_items, D):
    stdv = 1.0 / np.sqrt(D)
    names_shapes = [
        ('item_emb', (n_items, D)),
        ('w_in', (D, D)), ('b_in', (1, D)),
        ('w_out', (D, D)), ('b_out', (1, D)),
        ('w_ih', (2 * D, 3 * D)), ('b_ih', (1, 3 * D)),
        ('w_hh', (D, 3 * D)), ('b_hh', (1, 3 * D)),
        ('w1', (D, D)), ('b1', (1, D)),
        ('w2', (D, D)), ('b2', (1, D)),
        ('w3', (1, D)),                       # linear_three, no bias
        ('wt', (2 * D, D)), ('bt', (1, D)),   # linear_transform
    ]
    keys = jax.random.split(key, len(names_shapes))
    return {
        name: jax.random.uniform(k, shape, jnp.float32, -stdv, stdv)
        for k, (name, shape) in zip(keys, names_shapes)
    }


if __name__ == "__main__":
    D = 32        # embedding_size
    N = 16        # number of graph nodes in the batch
    B = 4         # batch (sessions)
    L = 8         # max sequence length
    n_items = 50
    step = 2      # GNN propagation steps
    E = 24        # number of edges

    key = jax.random.PRNGKey(0)
    kx, ke, ka, kl, kp = jax.random.split(key, 5)

    x = jax.random.randint(kx, (N,), 0, n_items, dtype=jnp.int32)
    edge_index = jax.random.randint(ke, (2, E), 0, N, dtype=jnp.int32)
    alias_inputs = jax.random.randint(ka, (B, L), 0, N, dtype=jnp.int32)
    item_seq_len = jax.random.randint(kl, (B,), 1, L + 1, dtype=jnp.int32)

    params = init_params(kp, n_items, D)

    forward = jax.jit(srgnn_forward, static_argnums=(5,))
    out = forward(params, x, edge_index, alias_inputs, item_seq_len, step)
    jax.block_until_ready(out)
    assert out.shape == (B, D)
    print("KERNEL_OK")
</pallas_src>

<mosaic_0001>
module attributes {stable_mosaic.version = 11 : i64} {
  func.func @kernel(%arg0: memref<16x16xf32, #tpu.memory_space<vmem>>, %arg1: memref<16x16xf32, #tpu.memory_space<vmem>>, %arg2: memref<16x128xf32, #tpu.memory_space<vmem>>, %arg3: memref<32x1xi32, #tpu.memory_space<vmem>>, %arg4: memref<4x1xi32, #tpu.memory_space<vmem>>, %arg5: memref<128x256xf32, #tpu.memory_space<vmem>>, %arg6: memref<1x256xf32, #tpu.memory_space<vmem>>, %arg7: memref<256x384xf32, #tpu.memory_space<vmem>>, %arg8: memref<1x384xf32, #tpu.memory_space<vmem>>, %arg9: memref<128x384xf32, #tpu.memory_space<vmem>>, %arg10: memref<1x384xf32, #tpu.memory_space<vmem>>, %arg11: memref<128x128xf32, #tpu.memory_space<vmem>>, %arg12: memref<1x128xf32, #tpu.memory_space<vmem>>, %arg13: memref<128x128xf32, #tpu.memory_space<vmem>>, %arg14: memref<1x128xf32, #tpu.memory_space<vmem>>, %arg15: memref<1x128xf32, #tpu.memory_space<vmem>>, %arg16: memref<256x128xf32, #tpu.memory_space<vmem>>, %arg17: memref<1x128xf32, #tpu.memory_space<vmem>>, %arg18: memref<4x128xf32, #tpu.memory_space<vmem>>) attributes {dimension_semantics = [], scalar_prefetch = 0 : i64, scratch_operands = 0 : i64, tpu.core_type = #tpu.core_type<tc>} {
    %c0 = arith.constant 0 : index
    %c0_0 = arith.constant 0 : index
    %0 = vector.load %arg0[%c0, %c0_0] : memref<16x16xf32, #tpu.memory_space<vmem>>, vector<16x16xf32>
    %1 = arith.truncf %0 : vector<16x16xf32> to vector<16x16xbf16>
    %c0_1 = arith.constant 0 : index
    %c0_2 = arith.constant 0 : index
    %2 = vector.load %arg1[%c0_1, %c0_2] : memref<16x16xf32, #tpu.memory_space<vmem>>, vector<16x16xf32>
    %3 = arith.truncf %2 : vector<16x16xf32> to vector<16x16xbf16>
    %c0_3 = arith.constant 0 : index
    %c0_4 = arith.constant 0 : index
    %4 = vector.load %arg5[%c0_3, %c0_4] : memref<128x256xf32, #tpu.memory_space<vmem>>, vector<128x256xf32>
    %5 = arith.truncf %4 : vector<128x256xf32> to vector<128x256xbf16>
    %c0_5 = arith.constant 0 : index
    %c0_6 = arith.constant 0 : index
    %6 = vector.load %arg6[%c0_5, %c0_6] : memref<1x256xf32, #tpu.memory_space<vmem>>, vector<1x256xf32>
    %c0_7 = arith.constant 0 : index
    %c0_8 = arith.constant 0 : index
    %7 = vector.load %arg7[%c0_7, %c0_8] : memref<256x384xf32, #tpu.memory_space<vmem>>, vector<256x384xf32>
    %8 = arith.truncf %7 : vector<256x384xf32> to vector<256x384xbf16>
    %c0_9 = arith.constant 0 : index
    %c0_10 = arith.constant 0 : index
    %9 = vector.load %arg8[%c0_9, %c0_10] : memref<1x384xf32, #tpu.memory_space<vmem>>, vector<1x384xf32>
    %c0_11 = arith.constant 0 : index
    %c0_12 = arith.constant 0 : index
    %10 = vector.load %arg9[%c0_11, %c0_12] : memref<128x384xf32, #tpu.memory_space<vmem>>, vector<128x384xf32>
    %11 = arith.truncf %10 : vector<128x384xf32> to vector<128x384xbf16>
    %c0_13 = arith.constant 0 : index
    %c0_14 = arith.constant 0 : index
    %12 = vector.load %arg10[%c0_13, %c0_14] : memref<1x384xf32, #tpu.memory_space<vmem>>, vector<1x384xf32>
    %c0_15 = arith.constant 0 : index
    %c0_16 = arith.constant 0 : index
    %13 = vector.load %arg2[%c0_15, %c0_16] : memref<16x128xf32, #tpu.memory_space<vmem>>, vector<16x128xf32>
    %c0_i32 = arith.constant 0 : i32
    %14 = arith.truncf %13 : vector<16x128xf32> to vector<16x128xbf16>
    %cst = arith.constant dense<0.000000e+00> : vector<16x256xf32>
    %15 = tpu.matmul %14, %5, %cst {dimension_numbers = #tpu.dot_dimension_numbers<[1], [0], [0], [1], [0, 0, 1, 1], [], []>} : vector<16x128xbf16>, vector<128x256xbf16>, vector<16x256xf32> -> vector<16x256xf32>
    %16 = vector.broadcast %6 : vector<1x256xf32> to vector<16x256xf32>
    %17 = arith.addf %15, %16 : vector<16x256xf32>
    %18 = vector.extract_strided_slice %17 {offsets = [0, 0], sizes = [16, 128], strides = [1, 1]} : vector<16x256xf32> to vector<16x128xf32>
    %19 = arith.truncf %18 : vector<16x128xf32> to vector<16x128xbf16>
    %cst_17 = arith.constant dense<0.000000e+00> : vector<16x128xf32>
    %20 = tpu.matmul %1, %19, %cst_17 {dimension_numbers = #tpu.dot_dimension_numbers<[1], [0], [0], [1], [0, 0, 1, 1], [], []>} : vector<16x16xbf16>, vector<16x128xbf16>, vector<16x128xf32> -> vector<16x128xf32>
    %21 = vector.extract_strided_slice %17 {offsets = [0, 128], sizes = [16, 128], strides = [1, 1]} : vector<16x256xf32> to vector<16x128xf32>
    %22 = arith.truncf %21 : vector<16x128xf32> to vector<16x128xbf16>
    %cst_18 = arith.constant dense<0.000000e+00> : vector<16x128xf32>
    %23 = tpu.matmul %3, %22, %cst_18 {dimension_numbers = #tpu.dot_dimension_numbers<[1], [0], [0], [1], [0, 0, 1, 1], [], []>} : vector<16x16xbf16>, vector<16x128xbf16>, vector<16x128xf32> -> vector<16x128xf32>
    %24 = arith.truncf %20 : vector<16x128xf32> to vector<16x128xbf16>
    %25 = vector.extract_strided_slice %8 {offsets = [0, 0], sizes = [128, 384], strides = [1, 1]} : vector<256x384xbf16> to vector<128x384xbf16>
    %cst_19 = arith.constant dense<0.000000e+00> : vector<16x384xf32>
    %26 = tpu.matmul %24, %25, %cst_19 {dimension_numbers = #tpu.dot_dimension_numbers<[1], [0], [0], [1], [0, 0, 1, 1], [], []>} : vector<16x128xbf16>, vector<128x384xbf16>, vector<16x384xf32> -> vector<16x384xf32>
    %27 = arith.truncf %23 : vector<16x128xf32> to vector<16x128xbf16>
    %28 = vector.extract_strided_slice %8 {offsets = [128, 0], sizes = [128, 384], strides = [1, 1]} : vector<256x384xbf16> to vector<128x384xbf16>
    %cst_20 = arith.constant dense<0.000000e+00> : vector<16x384xf32>
    %29 = tpu.matmul %27, %28, %cst_20 {dimension_numbers = #tpu.dot_dimension_numbers<[1], [0], [0], [1], [0, 0, 1, 1], [], []>} : vector<16x128xbf16>, vector<128x384xbf16>, vector<16x384xf32> -> vector<16x384xf32>
    %30 = arith.addf %26, %29 : vector<16x384xf32>
    %31 = vector.broadcast %9 : vector<1x384xf32> to vector<16x384xf32>
    %32 = arith.addf %30, %31 : vector<16x384xf32>
    %cst_21 = arith.constant dense<0.000000e+00> : vector<16x384xf32>
    %33 = tpu.matmul %14, %11, %cst_21 {dimension_numbers = #tpu.dot_dimension_numbers<[1], [0], [0], [1], [0, 0, 1, 1], [], []>} : vector<16x128xbf16>, vector<128x384xbf16>, vector<16x384xf32> -> vector<16x384xf32>
    %34 = vector.broadcast %12 : vector<1x384xf32> to vector<16x384xf32>
    %35 = arith.addf %33, %34 : vector<16x384xf32>
    %36 = vector.extract_strided_slice %32 {offsets = [0, 0], sizes = [16, 128], strides = [1, 1]} : vector<16x384xf32> to vector<16x128xf32>
    %37 = vector.extract_strided_slice %32 {offsets = [0, 128], sizes = [16, 128], strides = [1, 1]} : vector<16x384xf32> to vector<16x128xf32>
    %38 = vector.extract_strided_slice %32 {offsets = [0, 256], sizes = [16, 128], strides = [1, 1]} : vector<16x384xf32> to vector<16x128xf32>
    %39 = vector.extract_strided_slice %35 {offsets = [0, 0], sizes = [16, 128], strides = [1, 1]} : vector<16x384xf32> to vector<16x128xf32>
    %40 = vector.extract_strided_slice %35 {offsets = [0, 128], sizes = [16, 128], strides = [1, 1]} : vector<16x384xf32> to vector<16x128xf32>
    %41 = vector.extract_strided_slice %35 {offsets = [0, 256], sizes = [16, 128], strides = [1, 1]} : vector<16x384xf32> to vector<16x128xf32>
    %42 = arith.addf %36, %39 : vector<16x128xf32>
    %43 = arith.negf %42 : vector<16x128xf32>
    %44 = math.exp %43 : vector<16x128xf32>
    %cst_22 = arith.constant 1.000000e+00 : f32
    %45 = vector.broadcast %cst_22 : f32 to vector<16x128xf32>
    %46 = arith.addf %45, %44 : vector<16x128xf32>
    %47 = arith.divf %45, %46 : vector<16x128xf32>
    %48 = arith.addf %37, %40 : vector<16x128xf32>
    %49 = arith.negf %48 : vector<16x128xf32>
    %50 = math.exp %49 : vector<16x128xf32>
    %cst_23 = arith.constant 1.000000e+00 : f32
    %51 = vector.broadcast %cst_23 : f32 to vector<16x128xf32>
    %52 = arith.addf %51, %50 : vector<16x128xf32>
    %53 = arith.divf %51, %52 : vector<16x128xf32>
    %54 = arith.mulf %47, %41 : vector<16x128xf32>
    %55 = arith.addf %38, %54 : vector<16x128xf32>
    %56 = math.tanh %55 : vector<16x128xf32>
    %cst_24 = arith.constant 1.000000e+00 : f32
    %57 = vector.broadcast %cst_24 : f32 to vector<16x128xf32>
    %58 = arith.subf %57, %53 : vector<16x128xf32>
    %59 = arith.mulf %58, %13 : vector<16x128xf32>
    %60 = arith.mulf %53, %56 : vector<16x128xf32>
    %61 = arith.addf %59, %60 : vector<16x128xf32>
    %c1_i32 = arith.constant 1 : i32
    %62 = arith.truncf %61 : vector<16x128xf32> to vector<16x128xbf16>
    %cst_25 = arith.constant dense<0.000000e+00> : vector<16x256xf32>
    %63 = tpu.matmul %62, %5, %cst_25 {dimension_numbers = #tpu.dot_dimension_numbers<[1], [0], [0], [1], [0, 0, 1, 1], [], []>} : vector<16x128xbf16>, vector<128x256xbf16>, vector<16x256xf32> -> vector<16x256xf32>
    %64 = vector.broadcast %6 : vector<1x256xf32> to vector<16x256xf32>
    %65 = arith.addf %63, %64 : vector<16x256xf32>
    %66 = vector.extract_strided_slice %65 {offsets = [0, 0], sizes = [16, 128], strides = [1, 1]} : vector<16x256xf32> to vector<16x128xf32>
    %67 = arith.truncf %66 : vector<16x128xf32> to vector<16x128xbf16>
    %cst_26 = arith.constant dense<0.000000e+00> : vector<16x128xf32>
    %68 = tpu.matmul %1, %67, %cst_26 {dimension_numbers = #tpu.dot_dimension_numbers<[1], [0], [0], [1], [0, 0, 1, 1], [], []>} : vector<16x16xbf16>, vector<16x128xbf16>, vector<16x128xf32> -> vector<16x128xf32>
    %69 = vector.extract_strided_slice %65 {offsets = [0, 128], sizes = [16, 128], strides = [1, 1]} : vector<16x256xf32> to vector<16x128xf32>
    %70 = arith.truncf %69 : vector<16x128xf32> to vector<16x128xbf16>
    %cst_27 = arith.constant dense<0.000000e+00> : vector<16x128xf32>
    %71 = tpu.matmul %3, %70, %cst_27 {dimension_numbers = #tpu.dot_dimension_numbers<[1], [0], [0], [1], [0, 0, 1, 1], [], []>} : vector<16x16xbf16>, vector<16x128xbf16>, vector<16x128xf32> -> vector<16x128xf32>
    %72 = arith.truncf %68 : vector<16x128xf32> to vector<16x128xbf16>
    %73 = vector.extract_strided_slice %8 {offsets = [0, 0], sizes = [128, 384], strides = [1, 1]} : vector<256x384xbf16> to vector<128x384xbf16>
    %cst_28 = arith.constant dense<0.000000e+00> : vector<16x384xf32>
    %74 = tpu.matmul %72, %73, %cst_28 {dimension_numbers = #tpu.dot_dimension_numbers<[1], [0], [0], [1], [0, 0, 1, 1], [], []>} : vector<16x128xbf16>, vector<128x384xbf16>, vector<16x384xf32> -> vector<16x384xf32>
    %75 = arith.truncf %71 : vector<16x128xf32> to vector<16x128xbf16>
    %76 = vector.extract_strided_slice %8 {offsets = [128, 0], sizes = [128, 384], strides = [1, 1]} : vector<256x384xbf16> to vector<128x384xbf16>
    %cst_29 = arith.constant dense<0.000000e+00> : vector<16x384xf32>
    %77 = tpu.matmul %75, %76, %cst_29 {dimension_numbers = #tpu.dot_dimension_numbers<[1], [0], [0], [1], [0, 0, 1, 1], [], []>} : vector<16x128xbf16>, vector<128x384xbf16>, vector<16x384xf32> -> vector<16x384xf32>
    %78 = arith.addf %74, %77 : vector<16x384xf32>
    %79 = vector.broadcast %9 : vector<1x384xf32> to vector<16x384xf32>
    %80 = arith.addf %78, %79 : vector<16x384xf32>
    %cst_30 = arith.constant dense<0.000000e+00> : vector<16x384xf32>
    %81 = tpu.matmul %62, %11, %cst_30 {dimension_numbers = #tpu.dot_dimension_numbers<[1], [0], [0], [1], [0, 0, 1, 1], [], []>} : vector<16x128xbf16>, vector<128x384xbf16>, vector<16x384xf32> -> vector<16x384xf32>
    %82 = vector.broadcast %12 : vector<1x384xf32> to vector<16x384xf32>
    %83 = arith.addf %81, %82 : vector<16x384xf32>
    %84 = vector.extract_strided_slice %80 {offsets = [0, 0], sizes = [16, 128], strides = [1, 1]} : vector<16x384xf32> to vector<16x128xf32>
    %85 = vector.extract_strided_slice %80 {offsets = [0, 128], sizes = [16, 128], strides = [1, 1]} : vector<16x384xf32> to vector<16x128xf32>
    %86 = vector.extract_strided_slice %80 {offsets = [0, 256], sizes = [16, 128], strides = [1, 1]} : vector<16x384xf32> to vector<16x128xf32>
    %87 = vector.extract_strided_slice %83 {offsets = [0, 0], sizes = [16, 128], strides = [1, 1]} : vector<16x384xf32> to vector<16x128xf32>
    %88 = vector.extract_strided_slice %83 {offsets = [0, 128], sizes = [16, 128], strides = [1, 1]} : vector<16x384xf32> to vector<16x128xf32>
    %89 = vector.extract_strided_slice %83 {offsets = [0, 256], sizes = [16, 128], strides = [1, 1]} : vector<16x384xf32> to vector<16x128xf32>
    %90 = arith.addf %84, %87 : vector<16x128xf32>
    %91 = arith.negf %90 : vector<16x128xf32>
    %92 = math.exp %91 : vector<16x128xf32>
    %cst_31 = arith.constant 1.000000e+00 : f32
    %93 = vector.broadcast %cst_31 : f32 to vector<16x128xf32>
    %94 = arith.addf %93, %92 : vector<16x128xf32>
    %95 = arith.divf %93, %94 : vector<16x128xf32>
    %96 = arith.addf %85, %88 : vector<16x128xf32>
    %97 = arith.negf %96 : vector<16x128xf32>
    %98 = math.exp %97 : vector<16x128xf32>
    %cst_32 = arith.constant 1.000000e+00 : f32
    %99 = vector.broadcast %cst_32 : f32 to vector<16x128xf32>
    %100 = arith.addf %99, %98 : vector<16x128xf32>
    %101 = arith.divf %99, %100 : vector<16x128xf32>
    %102 = arith.mulf %95, %89 : vector<16x128xf32>
    %103 = arith.addf %86, %102 : vector<16x128xf32>
    %104 = math.tanh %103 : vector<16x128xf32>
    %cst_33 = arith.constant 1.000000e+00 : f32
    %105 = vector.broadcast %cst_33 : f32 to vector<16x128xf32>
    %106 = arith.subf %105, %101 : vector<16x128xf32>
    %107 = arith.mulf %106, %61 : vector<16x128xf32>
    %108 = arith.mulf %101, %104 : vector<16x128xf32>
    %109 = arith.addf %107, %108 : vector<16x128xf32>
    %c0_34 = arith.constant 0 : index
    %c0_35 = arith.constant 0 : index
    %110 = vector.load %arg3[%c0_34, %c0_35] : memref<32x1xi32, #tpu.memory_space<vmem>>, vector<32x1xi32>
    %111 = tpu.iota {dimensions = array<i32: 1>} : vector<32x16xi32>
    %112 = vector.broadcast %110 : vector<32x1xi32> to vector<32x16xi32>
    %113 = arith.cmpi eq, %112, %111 : vector<32x16xi32>
    %114 = arith.extui %113 : vector<32x16xi1> to vector<32x16xi32>
    %115 = arith.sitofp %114 : vector<32x16xi32> to vector<32x16xf32>
    %cst_36 = arith.constant dense<0.000000e+00> : vector<32x128xf32>
    %116 = tpu.matmul %115, %109, %cst_36 {dimension_numbers = #tpu.dot_dimension_numbers<[1], [0], [0], [1], [0, 0, 1, 1], [], []>} : vector<32x16xf32>, vector<16x128xf32>, vector<32x128xf32> -> vector<32x128xf32>
    %c0_37 = arith.constant 0 : index
    %c0_38 = arith.constant 0 : index
    %117 = vector.load %arg4[%c0_37, %c0_38] : memref<4x1xi32, #tpu.memory_space<vmem>>, vector<4x1xi32>
    %118 = tpu.iota {dimensions = array<i32: 1>} : vector<4x16xi32>
    %119 = vector.broadcast %117 : vector<4x1xi32> to vector<4x16xi32>
    %120 = arith.cmpi eq, %119, %118 : vector<4x16xi32>
    %121 = arith.extui %120 : vector<4x16xi1> to vector<4x16xi32>
    %122 = arith.sitofp %121 : vector<4x16xi32> to vector<4x16xf32>
    %cst_39 = arith.constant dense<0.000000e+00> : vector<4x128xf32>
    %123 = tpu.matmul %122, %109, %cst_39 {dimension_numbers = #tpu.dot_dimension_numbers<[1], [0], [0], [1], [0, 0, 1, 1], [], []>} : vector<4x16xf32>, vector<16x128xf32>, vector<4x128xf32> -> vector<4x128xf32>
    %124 = arith.truncf %123 : vector<4x128xf32> to vector<4x128xbf16>
    %c0_40 = arith.constant 0 : index
    %c0_41 = arith.constant 0 : index
    %125 = vector.load %arg11[%c0_40, %c0_41] : memref<128x128xf32, #tpu.memory_space<vmem>>, vector<128x128xf32>
    %126 = arith.truncf %125 : vector<128x128xf32> to vector<128x128xbf16>
    %cst_42 = arith.constant dense<0.000000e+00> : vector<4x128xf32>
    %127 = tpu.matmul %124, %126, %cst_42 {dimension_numbers = #tpu.dot_dimension_numbers<[1], [0], [0], [1], [0, 0, 1, 1], [], []>} : vector<4x128xbf16>, vector<128x128xbf16>, vector<4x128xf32> -> vector<4x128xf32>
    %c0_43 = arith.constant 0 : index
    %c0_44 = arith.constant 0 : index
    %128 = vector.load %arg12[%c0_43, %c0_44] : memref<1x128xf32, #tpu.memory_space<vmem>>, vector<1x128xf32>
    %129 = vector.broadcast %128 : vector<1x128xf32> to vector<4x128xf32>
    %130 = arith.addf %127, %129 : vector<4x128xf32>
    %131 = arith.truncf %116 : vector<32x128xf32> to vector<32x128xbf16>
    %c0_45 = arith.constant 0 : index
    %c0_46 = arith.constant 0 : index
    %132 = vector.load %arg13[%c0_45, %c0_46] : memref<128x128xf32, #tpu.memory_space<vmem>>, vector<128x128xf32>
    %133 = arith.truncf %132 : vector<128x128xf32> to vector<128x128xbf16>
    %cst_47 = arith.constant dense<0.000000e+00> : vector<32x128xf32>
    %134 = tpu.matmul %131, %133, %cst_47 {dimension_numbers = #tpu.dot_dimension_numbers<[1], [0], [0], [1], [0, 0, 1, 1], [], []>} : vector<32x128xbf16>, vector<128x128xbf16>, vector<32x128xf32> -> vector<32x128xf32>
    %c0_48 = arith.constant 0 : index
    %c0_49 = arith.constant 0 : index
    %135 = vector.load %arg14[%c0_48, %c0_49] : memref<1x128xf32, #tpu.memory_space<vmem>>, vector<1x128xf32>
    %136 = vector.broadcast %135 : vector<1x128xf32> to vector<32x128xf32>
    %137 = arith.addf %134, %136 : vector<32x128xf32>
    %138 = tpu.iota {dimensions = array<i32: 0>} : vector<32x4xi32>
    %139 = tpu.iota {dimensions = array<i32: 1>} : vector<32x4xi32>
    %c8_i32 = arith.constant 8 : i32
    %140 = vector.broadcast %c8_i32 : i32 to vector<32x4xi32>
    %141 = arith.muli %139, %140 : vector<32x4xi32>
    %142 = arith.cmpi sge, %138, %141 : vector<32x4xi32>
    %c1_i32_50 = arith.constant 1 : i32
    %143 = vector.broadcast %c1_i32_50 : i32 to vector<32x4xi32>
    %144 = arith.addi %139, %143 : vector<32x4xi32>
    %c8_i32_51 = arith.constant 8 : i32
    %145 = vector.broadcast %c8_i32_51 : i32 to vector<32x4xi32>
    %146 = arith.muli %144, %145 : vector<32x4xi32>
    %147 = arith.cmpi slt, %138, %146 : vector<32x4xi32>
    %148 = arith.andi %142, %147 : vector<32x4xi1>
    %149 = arith.extui %148 : vector<32x4xi1> to vector<32x4xi32>
    %150 = arith.sitofp %149 : vector<32x4xi32> to vector<32x4xf32>
    %cst_52 = arith.constant dense<0.000000e+00> : vector<32x128xf32>
    %151 = tpu.matmul %150, %130, %cst_52 {dimension_numbers = #tpu.dot_dimension_numbers<[1], [0], [0], [1], [0, 0, 1, 1], [], []>} : vector<32x4xf32>, vector<4x128xf32>, vector<32x128xf32> -> vector<32x128xf32>
    %152 = arith.addf %151, %137 : vector<32x128xf32>
    %153 = arith.negf %152 : vector<32x128xf32>
    %154 = math.exp %153 : vector<32x128xf32>
    %cst_53 = arith.constant 1.000000e+00 : f32
    %155 = vector.broadcast %cst_53 : f32 to vector<32x128xf32>
    %156 = arith.addf %155, %154 : vector<32x128xf32>
    %157 = arith.divf %155, %156 : vector<32x128xf32>
    %c0_54 = arith.constant 0 : index
    %c0_55 = arith.constant 0 : index
    %158 = vector.load %arg15[%c0_54, %c0_55] : memref<1x128xf32, #tpu.memory_space<vmem>>, vector<1x128xf32>
    %159 = vector.broadcast %158 : vector<1x128xf32> to vector<32x128xf32>
    %160 = arith.mulf %157, %159 : vector<32x128xf32>
    %cst_56 = arith.constant dense<0.000000e+00> : vector<32xf32>
    %161 = vector.multi_reduction <add>, %160, %cst_56 [1] : vector<32x128xf32> to vector<32xf32>
    %162 = vector.shape_cast %161 : vector<32xf32> to vector<32x1xf32>
    %c0_i32_57 = arith.constant 0 : i32
    %163 = vector.broadcast %c0_i32_57 : i32 to vector<32x1xi32>
    %164 = arith.cmpi sgt, %110, %163 : vector<32x1xi32>
    %165 = arith.extui %164 : vector<32x1xi1> to vector<32x1xi32>
    %166 = arith.sitofp %165 : vector<32x1xi32> to vector<32x1xf32>
    %167 = arith.mulf %162, %166 : vector<32x1xf32>
    %168 = vector.broadcast %167 : vector<32x1xf32> to vector<32x128xf32>
    %169 = arith.mulf %116, %168 : vector<32x128xf32>
    %170 = tpu.iota {dimensions = array<i32: 1>} : vector<4x32xi32>
    %171 = tpu.iota {dimensions = array<i32: 0>} : vector<4x32xi32>
    %c8_i32_58 = arith.constant 8 : i32
    %172 = vector.broadcast %c8_i32_58 : i32 to vector<4x32xi32>
    %173 = arith.muli %171, %172 : vector<4x32xi32>
    %174 = arith.cmpi sge, %170, %173 : vector<4x32xi32>
    %c1_i32_59 = arith.constant 1 : i32
    %175 = vector.broadcast %c1_i32_59 : i32 to vector<4x32xi32>
    %176 = arith.addi %171, %175 : vector<4x32xi32>
    %c8_i32_60 = arith.constant 8 : i32
    %177 = vector.broadcast %c8_i32_60 : i32 to vector<4x32xi32>
    %178 = arith.muli %176, %177 : vector<4x32xi32>
    %179 = arith.cmpi slt, %170, %178 : vector<4x32xi32>
    %180 = arith.andi %174, %179 : vector<4x32xi1>
    %181 = arith.extui %180 : vector<4x32xi1> to vector<4x32xi32>
    %182 = arith.sitofp %181 : vector<4x32xi32> to vector<4x32xf32>
    %cst_61 = arith.constant dense<0.000000e+00> : vector<4x128xf32>
    %183 = tpu.matmul %182, %169, %cst_61 {dimension_numbers = #tpu.dot_dimension_numbers<[1], [0], [0], [1], [0, 0, 1, 1], [], []>} : vector<4x32xf32>, vector<32x128xf32>, vector<4x128xf32> -> vector<4x128xf32>
    %c0_62 = arith.constant 0 : index
    %c0_63 = arith.constant 0 : index
    %184 = vector.load %arg16[%c0_62, %c0_63] : memref<256x128xf32, #tpu.memory_space<vmem>>, vector<256x128xf32>
    %185 = arith.truncf %184 : vector<256x128xf32> to vector<256x128xbf16>
    %186 = arith.truncf %183 : vector<4x128xf32> to vector<4x128xbf16>
    %187 = vector.extract_strided_slice %185 {offsets = [0, 0], sizes = [128, 128], strides = [1, 1]} : vector<256x128xbf16> to vector<128x128xbf16>
    %cst_64 = arith.constant dense<0.000000e+00> : vector<4x128xf32>
    %188 = tpu.matmul %186, %187, %cst_64 {dimension_numbers = #tpu.dot_dimension_numbers<[1], [0], [0], [1], [0, 0, 1, 1], [], []>} : vector<4x128xbf16>, vector<128x128xbf16>, vector<4x128xf32> -> vector<4x128xf32>
    %189 = arith.truncf %123 : vector<4x128xf32> to vector<4x128xbf16>
    %190 = vector.extract_strided_slice %185 {offsets = [128, 0], sizes = [128, 128], strides = [1, 1]} : vector<256x128xbf16> to vector<128x128xbf16>
    %cst_65 = arith.constant dense<0.000000e+00> : vector<4x128xf32>
    %191 = tpu.matmul %189, %190, %cst_65 {dimension_numbers = #tpu.dot_dimension_numbers<[1], [0], [0], [1], [0, 0, 1, 1], [], []>} : vector<4x128xbf16>, vector<128x128xbf16>, vector<4x128xf32> -> vector<4x128xf32>
    %192 = arith.addf %188, %191 : vector<4x128xf32>
    %c0_66 = arith.constant 0 : index
    %c0_67 = arith.constant 0 : index
    %193 = vector.load %arg17[%c0_66, %c0_67] : memref<1x128xf32, #tpu.memory_space<vmem>>, vector<1x128xf32>
    %194 = vector.broadcast %193 : vector<1x128xf32> to vector<4x128xf32>
    %195 = arith.addf %192, %194 : vector<4x128xf32>
    %c0_68 = arith.constant 0 : index
    %c0_69 = arith.constant 0 : index
    %196 = vector.load %arg18[%c0_68, %c0_69] : memref<4x128xf32, #tpu.memory_space<vmem>>, vector<4x128xf32>
    tpu.vector_store %arg18[%c0_68, %c0_69], %195 {strides = array<i32>} : memref<4x128xf32, #tpu.memory_space<vmem>>, vector<4x128xf32>,
    return
  }
}

</mosaic_0001>

<bundles_post_ra>
// kernel: srgnn_forward.1
= control target key start
LH: loop header
LB: loop body
LE: loop exit
PB: predicated region body
PF: predicated region fallthrough
CT: control target
= control target key end

     0   :  { %s4162_s0 = inlined_call_operand.vmem [shape: f32[16,16], index: 0, kind: input, shape index: {}]   ;;  %s4163_s1 = inlined_call_operand.vmem [shape: f32[16,16], index: 1, kind: input, shape index: {}]   ;;  %s4164_s2 = inlined_call_operand.vmem [shape: f32[16,128], index: 2, kind: input, shape index: {}]   ;;  %s4165_s3 = inlined_call_operand.vmem [shape: s32[32,1], index: 3, kind: input, shape index: {}]   ;;  %s4166_s4 = inlined_call_operand.vmem [shape: s32[4,1], index: 4, kind: input, shape index: {}]   ;;  %s4167_s5 = inlined_call_operand.vmem [shape: f32[128,256], index: 5, kind: input, shape index: {}]   ;;  %s4168_s6 = inlined_call_operand.vmem [shape: f32[1,256], index: 6, kind: input, shape index: {}]   ;;  %s4169_s7 = inlined_call_operand.vmem [shape: f32[256,384], index: 7, kind: input, shape index: {}]   ;;  %s4170_s8 = inlined_call_operand.vmem [shape: f32[1,384], index: 8, kind: input, shape index: {}]   ;;  %s4171_s9 = inlined_call_operand.vmem [shape: f32[128,384], index: 9, kind: input, shape index: {}]   ;;  %s4172_s10 = inlined_call_operand.vmem [shape: f32[1,384], index: 10, kind: input, shape index: {}]   ;;  %s4173_s11 = inlined_call_operand.vmem [shape: f32[128,128], index: 11, kind: input, shape index: {}]   ;;  %s4174_s12 = inlined_call_operand.vmem [shape: f32[1,128], index: 12, kind: input, shape index: {}]   ;;  %s4175_s13 = inlined_call_operand.vmem [shape: f32[128,128], index: 13, kind: input, shape index: {}]   ;;  %s4176_s14 = inlined_call_operand.vmem [shape: f32[1,128], index: 14, kind: input, shape index: {}]   ;;  %s4177_s15 = inlined_call_operand.vmem [shape: f32[1,128], index: 15, kind: input, shape index: {}]   ;;  %s4178_s16 = inlined_call_operand.vmem [shape: f32[256,128], index: 16, kind: input, shape index: {}]   ;;  %s4179_s17 = inlined_call_operand.vmem [shape: f32[1,128], index: 17, kind: input, shape index: {}]   ;;  %s4180_s18 = inlined_call_operand.hbm [shape: f32[4,128], index: 18, kind: output, shape index: {}]  }
   0x1   :  { %4231 = sst [smem:[#allocation47_spill]] %s4162_s0 }
   0x2   :  { %4232 = sst [smem:[#allocation48_spill]] %s4163_s1 }
   0x3   :  { %4233 = sst [smem:[#allocation49_spill]] %s4164_s2 }
   0x4   :  { %v68_v0 = vld [vmem:[%s4167_s5 + $0x8] sm:$0xff]  ;;  %v70_v1 = vld [vmem:[%s4167_s5 + $0x18] sm:$0xff]  ;;  %v67_v2 = vld [vmem:[%s4167_s5] sm:$0xff]  ;;  %v4185_v7 = vmov 0  }
   0x5   :  { %v2718_v3 = vpack.c.bf16 %v70_v1, %v68_v0  ;;  %v69_v4 = vld [vmem:[%s4167_s5 + $0x10] sm:$0xff]  ;;  %v72_v5 = vld [vmem:[%s4167_s5 + $0x28] sm:$0xff]  ;;  %v74_v6 = vld [vmem:[%s4167_s5 + $0x38] sm:$0xff]  ;;  %380 = vmatprep.mubr.bf16.mxu0 %v4185_v7  ;;  %2527 = vset.pattern.permute.xlu0 %v4185_v7 }
   0x6   :  { %v2731_v8 = vpack.c.bf16 %v69_v4, %v67_v2  ;;  %v2733_v9 = vpack.c.bf16 %v74_v6, %v72_v5  ;;  %v71_v10 = vld [vmem:[%s4167_s5 + $0x20] sm:$0xff]  ;;  %v73_v11 = vld [vmem:[%s4167_s5 + $0x30] sm:$0xff]  ;;  %v76_v12 = vld [vmem:[%s4167_s5 + $0x48] sm:$0xff]  ;;  %2528 = vset.pattern.permute.xlu1 %v4185_v7 }
   0x7   :  { %348 = vmatprep.subr.bf16.mxu0 %v2718_v3  ;;  %v78_v13 = vld [vmem:[%s4167_s5 + $0x58] sm:$0xff]  ;;  %v2750_v14 = vpack.c.bf16 %v73_v11, %v71_v10  ;;  %v75_v16 = vld [vmem:[%s4167_s5 + $0x40] sm:$0xff]  ;;  %v77_v17 = vld [vmem:[%s4167_s5 + $0x50] sm:$0xff] }
   0x8   :  { %349 = vmatpush1.bf16.msra.mxu0 %v2731_v8  ;;  %v2753_v15 = vpack.c.bf16 %v78_v13, %v76_v12  ;;  %v80_v18 = vld [vmem:[%s4167_s5 + $0x68] sm:$0xff]  ;;  %v82_v19 = vld [vmem:[%s4167_s5 + $0x78] sm:$0xff]  ;;  %v2768_v20 = vpack.c.bf16 %v77_v17, %v75_v16  ;;  %v79_v22 = vld [vmem:[%s4167_s5 + $0x60] sm:$0xff] }
   0x9   :  { %350 = vmatprep.subr.bf16.mxu0 %v2733_v9  ;;  %v2771_v21 = vpack.c.bf16 %v82_v19, %v80_v18  ;;  %v81_v23 = vld [vmem:[%s4167_s5 + $0x70] sm:$0xff]  ;;  %v84_v24 = vld [vmem:[%s4167_s5 + $0x88] sm:$0xff]  ;;  %v86_v25 = vld [vmem:[%s4167_s5 + $0x98] sm:$0xff] }
   0xc   :  { %351 = vmatpush1.bf16.msra.mxu0 %v2750_v14 }
   0xd   :  { %352 = vmatprep.subr.bf16.mxu0 %v2753_v15 }
   0xe   :  { %23 = vsyncpa [#allocation3], 0  ;;  %v2786_v26 = vpack.c.bf16 %v81_v23, %v79_v22  ;;  %v2789_v27 = vpack.c.bf16 %v86_v25, %v84_v24  ;;  %v83_v28 = vld [vmem:[%s4167_s5 + $0x80] sm:$0xff]  ;;  %v85_v29 = vld [vmem:[%s4167_s5 + $0x90] sm:$0xff]  ;;  %s4234_s1 = sld [smem:[#allocation49_spill]]  ;;  %v4187_v52 = vmov 0.0   ;;  %v4184_v5 = vlaneseq }
   0xf   :  { %v88_v30 = vld [vmem:[%s4167_s5 + $0xa8] sm:$0xff]  ;;  %v90_v31 = vld [vmem:[%s4167_s5 + $0xb8] sm:$0xff]  ;;  %v2804_v32 = vpack.c.bf16 %v85_v29, %v83_v28  ;;  %v87_v34 = vld [vmem:[%s4167_s5 + $0xa0] sm:$0xff]  ;;  %2217 = vmatprep.subr.bf16.mxu1 %v4187_v52  ;;  %vm2611_vm0 = vmmov 0   ;;  %vm392_vm1 = vcmask 130048   ;;  %vm1635_vm12 = vcmask 31744  }
  0x10   :  { %353 = vmatpush1.bf16.msra.mxu0 %v2768_v20  ;;  %v2807_v33 = vpack.c.bf16 %v90_v31, %v88_v30  ;;  %v89_v35 = vld [vmem:[%s4167_s5 + $0xb0] sm:$0xff]  ;;  %v92_v36 = vld [vmem:[%s4167_s5 + $0xc8] sm:$0xff]  ;;  %v94_v37 = vld [vmem:[%s4167_s5 + $0xd8] sm:$0xff]  ;;  %2219 = vmatprep.mubr.msk.bf16.mxu1 %vm2611_vm0, %v4187_v52  ;;  %v2928_v6 = vshrl.u32 %v4184_v5, 7  ;;  %s2613_s26 = smov [#allocation2]  }
  0x11   :  { %354 = vmatprep.subr.bf16.mxu0 %v2771_v21  ;;  %v2822_v38 = vpack.c.bf16 %v89_v35, %v87_v34  ;;  %v2825_v39 = vpack.c.bf16 %v94_v37, %v92_v36  ;;  %v91_v40 = vld [vmem:[%s4167_s5 + $0xc0] sm:$0xff]  ;;  %v93_v41 = vld [vmem:[%s4167_s5 + $0xd0] sm:$0xff]  ;;  %v96_v42 = vld [vmem:[%s4167_s5 + $0xe8] sm:$0xff] }
  0x12   :  { %v98_v43 = vld [vmem:[%s4167_s5 + $0xf8] sm:$0xff]  ;;  %v2840_v44 = vpack.c.bf16 %v93_v41, %v91_v40  ;;  %v95_v46 = vld [vmem:[%s4167_s5 + $0xe0] sm:$0xff]  ;;  %v97_v47 = vld [vmem:[%s4167_s5 + $0xf0] sm:$0xff]  ;;  %v2931_v10 = vsub.s32 0, %v2928_v6  ;;  %v2937_v12 = vsub.s32 1, %v2928_v6  ;;  %s4237_s5 = sld [smem:[#allocation48_spill]] }
  0x13   :  { %v2843_v45 = vpack.c.bf16 %v98_v43, %v96_v42  ;;  %v2852_v48 = vpack.c.bf16 %v97_v47, %v95_v46  ;;  %v166_v53 = vld [vmem:[%s4169_s7 + $0x190] sm:$0xff]  ;;  %v169_v54 = vld [vmem:[%s4169_s7 + $0x1a8] sm:$0xff]  ;;  %v172_v56 = vld [vmem:[%s4169_s7 + $0x1c0] sm:$0xff] }
  0x14   :  { %355 = vmatpush1.bf16.msra.mxu0 %v2786_v26  ;;  %v2857_v49 = vld [vmem:[%s4234_s1] sm:$0xff]  ;;  %v2862_v50 = vld [vmem:[%s4234_s1 + $0x8] sm:$0xff]  ;;  %v2883_v55 = vpack.c.bf16 %v169_v54, %v166_v53  ;;  %v175_v57 = vld [vmem:[%s4169_s7 + $0x1d8] sm:$0xff] }
  0x15   :  { %356 = vmatprep.subr.bf16.mxu0 %v2789_v27  ;;  %v2867_v51 = vpack.c.bf16 %v2862_v50, %v2857_v49  ;;  %v2893_v58 = vpack.c.bf16 %v175_v57, %v172_v56  ;;  %v178_v59 = vld [vmem:[%s4169_s7 + $0x1f0] sm:$0xff]  ;;  %v181_v60 = vld [vmem:[%s4169_s7 + $0x208] sm:$0xff]  ;;  %v184_v62 = vld [vmem:[%s4169_s7 + $0x220] sm:$0xff] }
  0x16   :  { %v2903_v61 = vpack.c.bf16 %v181_v60, %v178_v59  ;;  %v187_v63 = vld [vmem:[%s4169_s7 + $0x238] sm:$0xff]  ;;  %v190_v1 = vld [vmem:[%s4169_s7 + $0x250] sm:$0xff]  ;;  %v193_v2 = vld [vmem:[%s4169_s7 + $0x268] sm:$0xff] }
  0x17   :  { %v2913_v0 = vpack.c.bf16 %v187_v63, %v184_v62  ;;  %v2923_v4 = vpack.c.bf16 %v193_v2, %v190_v1  ;;  %v115_v11 = vld [vmem:[%s4168_s6] sm:$0x3]  ;;  %s4236_s6 = sld [smem:[#allocation47_spill]]  ;;  %v165_v34 = vld [vmem:[%s4169_s7 + $0x188] sm:$0xff]  ;;  %v167_v46 = vld [vmem:[%s4169_s7 + $0x198] sm:$0xff] }
  0x18   :  { %357 = vmatpush1.bf16.msra.mxu0 %v2804_v32  ;;  %v2940_v13 = vrot.slane %v115_v11, %v2931_v10  ;;  %v2943_v17 = vrot.slane %v115_v11, %v2937_v12  ;;  %v168_v35 = vld [vmem:[%s4169_s7 + $0x1a0] sm:$0xff]  ;;  %v65_v42 = vld [vmem:[%s4237_s5 + $0x8] sm:$0xff]  ;;  %v171_v47 = vld [vmem:[%s4169_s7 + $0x1b8] sm:$0xff] }
  0x19   :  { %358 = vmatprep.subr.bf16.mxu0 %v2807_v33  ;;  %4235 = vst [vmem:[#allocation5_spill] sm:$0xff] %v2923_v4  ;;  %v2964_v40 = vpack.c.bf16 %v168_v35, %v165_v34  ;;  %v64_v41 = vld [vmem:[%s4237_s5] sm:$0xff]  ;;  %v174_v53 = vld [vmem:[%s4169_s7 + $0x1d0] sm:$0xff]  ;;  %v173_v60 = vld [vmem:[%s4169_s7 + $0x1c8] sm:$0xff] }
  0x1a   :  { %v164_v43 = vld [vmem:[%s4169_s7 + $0x180] sm:$0xff]  ;;  %v2989_v54 = vpack.c.bf16 %v65_v42, %v64_v41  ;;  %v2993_v57 = vpack.c.bf16 %v174_v53, %v171_v47  ;;  %v170_v59 = vld [vmem:[%s4169_s7 + $0x1b0] sm:$0xff]  ;;  %v177_v62 = vld [vmem:[%s4169_s7 + $0x1e8] sm:$0xff] }
  0x1b   :  { %v2991_v56 = vpack.c.bf16 %v167_v46, %v164_v43  ;;  %v180_v63 = vld [vmem:[%s4169_s7 + $0x200] sm:$0xff]  ;;  %v3010_v1 = vpack.c.bf16 %v173_v60, %v170_v59  ;;  %v191_v35 = vld [vmem:[%s4169_s7 + $0x258] sm:$0xff]  ;;  %v198_v42 = vld [vmem:[%s4169_s7 + $0x290] sm:$0xff] }
  0x1c   :  { %359 = vmatpush1.bf16.msra.mxu0 %v2822_v38  ;;  %v3014_v2 = vpack.c.bf16 %v180_v63, %v177_v62  ;;  %v176_v11 = vld [vmem:[%s4169_s7 + $0x1e0] sm:$0xff]  ;;  %v195_v41 = vld [vmem:[%s4169_s7 + $0x278] sm:$0xff]  ;;  %v194_v46 = vld [vmem:[%s4169_s7 + $0x270] sm:$0xff] }
  0x1d   :  { %360 = vmatprep.subr.bf16.mxu0 %v2825_v39  ;;  %v61_v25 = vld [vmem:[%s4236_s6] sm:$0xff]  ;;  %v62_v28 = vld [vmem:[%s4236_s6 + $0x8] sm:$0xff]  ;;  %v3069_v43 = vpack.c.bf16 %v198_v42, %v195_v41  ;;  %v199_v60 = vld [vmem:[%s4169_s7 + $0x298] sm:$0xff] }
  0x1e   :  { %v2961_v37 = vpack.c.bf16 %v62_v28, %v61_v25  ;;  %v185_v25 = vld [vmem:[%s4169_s7 + $0x228] sm:$0xff]  ;;  %v188_v34 = vld [vmem:[%s4169_s7 + $0x240] sm:$0xff]  ;;  %v206_v42 = vld [vmem:[%s4169_s7 + $0x2d0] sm:$0xff] }
  0x1f   :  { %v189_v28 = vld [vmem:[%s4169_s7 + $0x248] sm:$0xff]  ;;  %v196_v53 = vld [vmem:[%s4169_s7 + $0x280] sm:$0xff] }
  0x20   :  { %361 = vmatpush1.bf16.msra.mxu0 %v2840_v44  ;;  %v197_v47 = vld [vmem:[%s4169_s7 + $0x288] sm:$0xff]  ;;  %v3086_v62 = vpack.c.bf16 %v199_v60, %v196_v53  ;;  %v211_v60 = vld [vmem:[%s4169_s7 + $0x2f8] sm:$0xff] }
  0x21   :  { %362 = vmatprep.subr.bf16.mxu0 %v2843_v45  ;;  %v3080_v59 = vpack.c.bf16 %v197_v47, %v194_v46  ;;  %v201_v63 = vld [vmem:[%s4169_s7 + $0x2a8] sm:$0xff]  ;;  %v208_v47 = vld [vmem:[%s4169_s7 + $0x2e0] sm:$0xff] }
  0x22   :  { %4238 = vst [vmem:[#allocation6_spill] sm:$0xff] %v3086_v62  ;;  %v209_v46 = vld [vmem:[%s4169_s7 + $0x2e8] sm:$0xff] }
  0x23   :  { %v3136_v53 = vpack.c.bf16 %v209_v46, %v206_v42  ;;  %v116_v46 = vld [vmem:[%s4169_s7] sm:$0xff] }
  0x24   :  { %363 = vmatpush1.bf16.msra.mxu0 %v2852_v48 }
  0x25   :  { %2229 = vmatprep.subr.bf16.mxu0 %v4187_v52 }
  0x27   :  { %381 = vmatmul.mubr.bf16.vlgmr.msra.gmra.mrb[0].mxu0 %v2867_v51 }
  0x28   :  { %2245 = vmatprep.mubr.msk.bf16.mxu0 %vm2611_vm0, %v4187_v52  ;;  %2230 = vmatpush3.bf16.msra.mxu0 %v2883_v55 }
  0x29   :  { %2231 = vmatprep.subr.bf16.mxu0 %v4187_v52 }
  0x2c   :  { %2232 = vmatpush3.bf16.msra.mxu0 %v2893_v58 }
  0x2d   :  { %2233 = vmatprep.subr.bf16.mxu0 %v4187_v52 }
  0x30   :  { %2234 = vmatpush3.bf16.msra.mxu0 %v2903_v61 }
  0x31   :  { %2235 = vmatprep.subr.bf16.mxu0 %v4187_v52 }
  0x34   :  { %2236 = vmatpush3.bf16.msra.mxu0 %v2913_v0 }
  0x35   :  { %2237 = vmatprep.subr.bf16.mxu0 %v4187_v52 }
  0x38   :  { %2238 = vmatpush3.bf16.msra.mxu0 %v2923_v4  ;;  %v125_v4 = vld [vmem:[%s4169_s7 + $0x48] sm:$0xff] }
  0x39   :  { %2239 = vmatprep.subr.bf16.mxu0 %v4187_v52 }
  0x3c   :  { %2240 = vmatpush3.bf16.msra.mxu0 %v3086_v62 }
  0x3d   :  { %2241 = vmatprep.subr.bf16.mxu0 %v4187_v52 }
  0xfa   :  { %v382_v16 = vpop.f32.mrb[0].mxu0 }
  0xfb   :  { %v384_v18 = vpop.f32.mrb[1].mxu0  ;;  %v383_v22 = vadd.f32 %v382_v16, %v2940_v13  ;;  %v179_v16 = vld [vmem:[%s4169_s7 + $0x1f8] sm:$0xff] }
  0xfc   :  { %v386_v19 = vpop.f32.mrb[2].mxu0  ;;  %v385_v29 = vadd.f32 %v384_v18, %v2943_v17  ;;  %v183_v18 = vld [vmem:[%s4169_s7 + $0x218] sm:$0xff] }
  0xfd   :  { %v387_v23 = vadd.f32 %v386_v19, %v2940_v13  ;;  %v388_v24 = vpop.f32.mrb[3].mxu0  ;;  %v186_v19 = vld [vmem:[%s4169_s7 + $0x230] sm:$0xff] }
  0xfe   :  { %v389_v30 = vadd.f32 %v388_v24, %v2943_v17  ;;  %v182_v24 = vld [vmem:[%s4169_s7 + $0x210] sm:$0xff] }
  0xff   :  { %v391_v31 = vpack.c.bf16 %v387_v23, %v383_v22  ;;  %v3029_v22 = vpack.c.bf16 %v179_v16, %v176_v11  ;;  %v3032_v23 = vpack.c.bf16 %v186_v19, %v183_v18  ;;  %v204_v11 = vld [vmem:[%s4169_s7 + $0x2c0] sm:$0xff]  ;;  %v203_v19 = vld [vmem:[%s4169_s7 + $0x2b8] sm:$0xff] }
 0x100   :  { %v437_v36 = vpack.c.bf16 %v389_v30, %v385_v29  ;;  %v192_v29 = vld [vmem:[%s4169_s7 + $0x260] sm:$0xff]  ;;  %v3047_v30 = vpack.c.bf16 %v185_v25, %v182_v24  ;;  %v3096_v16 = vpack.c.bf16 %v204_v11, %v201_v63  ;;  %v202_v24 = vld [vmem:[%s4169_s7 + $0x2b0] sm:$0xff]  ;;  %v3142_v63 = vpack.c.bf16 %v211_v60, %v208_v47  ;;  %v117_v11 = vld [vmem:[%s4169_s7 + $0x8] sm:$0xff] }
 0x101   :  { %2218 = vmatpush3.bf16.msra.mxu1 %v391_v31  ;;  %v3050_v31 = vpack.c.bf16 %v192_v29, %v189_v28  ;;  %v200_v18 = vld [vmem:[%s4169_s7 + $0x2a0] sm:$0xff]  ;;  %v205_v28 = vld [vmem:[%s4169_s7 + $0x2c8] sm:$0xff]  ;;  %v119_v47 = vld [vmem:[%s4169_s7 + $0x18] sm:$0xff] }
 0x102   :  { %2223 = vmatprep.subr.bf16.mxu1 %v4187_v52  ;;  %v3108_v25 = vpack.c.bf16 %v203_v19, %v200_v18  ;;  %v3114_v29 = vpack.c.bf16 %v205_v28, %v202_v24  ;;  %4240 = vst [vmem:[#allocation8_spill] sm:$0xff] %v3142_v63  ;;  %v120_v18 = vld [vmem:[%s4169_s7 + $0x20] sm:$0xff]  ;;  %v118_v60 = vld [vmem:[%s4169_s7 + $0x10] sm:$0xff]  ;;  %v3176_v5 = vpack.c.bf16 %v119_v47, %v116_v46  ;;  %v127_v46 = vld [vmem:[%s4169_s7 + $0x58] sm:$0xff] }
 0x103   :  { %v3152_v19 = vpack.c.bf16 %v120_v18, %v117_v11  ;;  %v121_v11 = vld [vmem:[%s4169_s7 + $0x28] sm:$0xff] }
 0x104   :  { %2220 = vmatmul.mubr.msk.bf16.vlgmr.msra.gmra.mrb[0].mxu1 %vm392_vm1, %v2961_v37  ;;  %4239 = vst [vmem:[#allocation7_spill] sm:$0xff] %v3114_v29  ;;  %2242 = vmatpush3.bf16.msra.mxu0 %v3114_v29  ;;  %4241 = vst [vmem:[#allocation9_spill] sm:$0xff] %v3176_v5  ;;  %v129_v47 = vld [vmem:[%s4169_s7 + $0x68] sm:$0xff] }
 0x105   :  { %2224 = vmatpush3.bf16.msra.mxu1 %v437_v36  ;;  %2225 = vmatprep.mubr.msk.bf16.mxu1 %vm2611_vm0, %v4187_v52  ;;  %v3059_v36 = vpack.c.bf16 %v191_v35, %v188_v34  ;;  %v207_v34 = vld [vmem:[%s4169_s7 + $0x2d8] sm:$0xff]  ;;  %v210_v35 = vld [vmem:[%s4169_s7 + $0x2f0] sm:$0xff] }
 0x106   :  { %484 = vmatprep.subr.bf16.mxu1 %v2964_v40  ;;  %v3124_v41 = vpack.c.bf16 %v210_v35, %v207_v34  ;;  %2243 = vmatprep.subr.bf16.mxu0 %v4187_v52 }
 0x108   :  { %2244 = vmatpush3.bf16.msra.mxu0 %v3142_v63 }
 0x109   :  { %2249 = vmatprep.subr.bf16.mxu0 %v4187_v52  ;;  %v122_v52 = vld [vmem:[%s4169_s7 + $0x30] sm:$0xff] }
 0x10c   :  { %2226 = vmatmul.mubr.msk.bf16.vlgmr.msra.gmra.mrb[4].mxu1 %vm392_vm1, %v2989_v54 }
 0x10d   :  { %485 = vmatpush1.bf16.msra.mxu1 %v2991_v56  ;;  %516 = vmatprep.mubr.bf16.mxu1 %v4185_v7  ;;  %v3178_v7 = vpack.c.bf16 %v121_v11, %v118_v60  ;;  %v3202_v60 = vpack.c.bf16 %v125_v4, %v122_v52  ;;  %v130_v52 = vld [vmem:[%s4169_s7 + $0x70] sm:$0xff]  ;;  %v133_v4 = vld [vmem:[%s4169_s7 + $0x88] sm:$0xff] }
 0x10e   :  { %486 = vmatprep.subr.bf16.mxu1 %v2993_v57 }
 0x10f   :  { %4242 = vst [vmem:[#allocation10_spill] sm:$0xff] %v3178_v7  ;;  %4244 = vst [vmem:[#allocation12_spill] sm:$0xff] %v3202_v60 }
 0x111   :  { %487 = vmatpush1.bf16.msra.mxu1 %v3010_v1 }
 0x112   :  { %488 = vmatprep.subr.bf16.mxu1 %v3014_v2 }
 0x115   :  { %489 = vmatpush1.bf16.msra.mxu1 %v3029_v22 }
 0x116   :  { %490 = vmatprep.subr.bf16.mxu1 %v3032_v23 }
 0x119   :  { %491 = vmatpush1.bf16.msra.mxu1 %v3047_v30 }
 0x11a   :  { %492 = vmatprep.subr.bf16.mxu1 %v3050_v31 }
 0x11d   :  { %493 = vmatpush1.bf16.msra.mxu1 %v3059_v36 }
 0x11e   :  { %494 = vmatprep.subr.bf16.mxu1 %v3069_v43 }
 0x121   :  { %495 = vmatpush1.bf16.msra.mxu1 %v3080_v59 }
 0x122   :  { %496 = vmatprep.subr.bf16.mxu1 %v3096_v16 }
 0x125   :  { %497 = vmatpush1.bf16.msra.mxu1 %v3108_v25 }
 0x126   :  { %498 = vmatprep.subr.bf16.mxu1 %v3124_v41 }
 0x129   :  { %499 = vmatpush1.bf16.msra.mxu1 %v3136_v53 }
 0x12a   :  { %568 = vmatprep.subr.bf16.mxu1 %v3152_v19 }
 0x1d7   :  { %v430_v24 = vpop.f32.mrb[0].mxu1 }
 0x1d8   :  { %v2221_v28 = vpop.f32.mrb[1].mxu1 }
 0x1d9   :  { %v433_v34 = vpop.f32.mrb[2].mxu1  ;;  %v126_v28 = vld [vmem:[%s4169_s7 + $0x50] sm:$0xff] }
 0x1da   :  { %v3156_v35 = vpack.c.bf16 %v433_v34, %v430_v24  ;;  %v2222_v42 = vpop.f32.mrb[3].mxu1  ;;  %v123_v24 = vld [vmem:[%s4169_s7 + $0x38] sm:$0xff] }
 0x1db   :  { %v3183_v62 = vpack.c.bf16 %v126_v28, %v123_v24  ;;  %v4246_v24 = vmov 0.0  }
 0x1dd   :  { %4243 = vst [vmem:[#allocation11_spill] sm:$0xff] %v3183_v62 }
 0x1df   :  { %v475_v18 = vpop.f32.mrb[4].mxu1 }
 0x1e0   :  { %v2227_v34 = vpop.f32.mrb[5].mxu1 }
 0x1e1   :  { %v478_v42 = vpop.f32.mrb[6].mxu1  ;;  %v124_v34 = vld [vmem:[%s4169_s7 + $0x40] sm:$0xff] }
 0x1e2   :  { %v483_v63 = vpack.c.bf16 %v478_v42, %v475_v18  ;;  %v2228_v29 = vpop.f32.mrb[7].mxu1  ;;  %v3204_v11 = vpack.c.bf16 %v127_v46, %v124_v34  ;;  %v128_v18 = vld [vmem:[%s4169_s7 + $0x60] sm:$0xff]  ;;  %v135_v42 = vld [vmem:[%s4169_s7 + $0x98] sm:$0xff]  ;;  %v138_v34 = vld [vmem:[%s4169_s7 + $0xb0] sm:$0xff]  ;;  %v4248_v46 = vmov 0  }
 0x1e3   :  { %v132_v29 = vld [vmem:[%s4169_s7 + $0x80] sm:$0xff] }
 0x1e4   :  { %517 = vmatmul.mubr.bf16.vlgmr.msra.gmra.mrb[8].mxu1 %v483_v63  ;;  %2246 = vmatmul.mubr.bf16.vlgmr.msra.gmra.mrb[4].mxu0 %v483_v63  ;;  %4245 = vst [vmem:[#allocation13_spill] sm:$0xff] %v3204_v11  ;;  %v3211_v28 = vpack.c.bf16 %v132_v29, %v129_v47  ;;  %v131_v63 = vld [vmem:[%s4169_s7 + $0x78] sm:$0xff]  ;;  %v3235_v29 = vpack.c.bf16 %v133_v4, %v130_v52  ;;  %v141_v52 = vld [vmem:[%s4169_s7 + $0xc8] sm:$0xff]  ;;  %v144_v4 = vld [vmem:[%s4169_s7 + $0xe0] sm:$0xff] }
 0x1e5   :  { %569 = vmatpush1.bf16.msra.mxu1 %v3176_v5  ;;  %2250 = vmatpush3.bf16.msra.mxu0 %v3178_v7  ;;  %v3233_v47 = vpack.c.bf16 %v131_v63, %v128_v18  ;;  %v3242_v7 = vpack.c.bf16 %v138_v34, %v135_v42  ;;  %v136_v18 = vld [vmem:[%s4169_s7 + $0xa0] sm:$0xff]  ;;  %v139_v63 = vld [vmem:[%s4169_s7 + $0xb8] sm:$0xff]  ;;  %v270_v5 = vld [vmem:[%s4171_s9 + $0x48] sm:$0xff] }
 0x1e6   :  { %570 = vmatprep.subr.bf16.mxu1 %v3183_v62  ;;  %2251 = vmatprep.subr.bf16.mxu0 %v4246_v24  ;;  %4247 = vst [vmem:[#allocation14_spill] sm:$0xff] %v3211_v28  ;;  %4250 = vst [vmem:[#allocation16_spill] sm:$0xff] %v3235_v29  ;;  %v134_v62 = vld [vmem:[%s4169_s7 + $0x90] sm:$0xff]  ;;  %v3263_v34 = vpack.c.bf16 %v139_v63, %v136_v18  ;;  %v147_v18 = vld [vmem:[%s4169_s7 + $0xf8] sm:$0xff] }
 0x1e7   :  { %600 = vmatprep.mubr.bf16.mxu1 %v4248_v46  ;;  %2265 = vmatprep.mubr.msk.bf16.mxu0 %vm2611_vm0, %v4246_v24  ;;  %4249 = vst [vmem:[#allocation15_spill] sm:$0xff] %v3233_v47  ;;  %4251 = vst [vmem:[#allocation17_spill] sm:$0xff] %v3242_v7  ;;  %v150_v63 = vld [vmem:[%s4169_s7 + $0x110] sm:$0xff] }
 0x1e8   :  { %4253 = vst [vmem:[#allocation19_spill] sm:$0xff] %v3263_v34 }
 0x1e9   :  { %571 = vmatpush1.bf16.msra.mxu1 %v3202_v60  ;;  %2252 = vmatpush3.bf16.msra.mxu0 %v3204_v11  ;;  %v137_v60 = vld [vmem:[%s4169_s7 + $0xa8] sm:$0xff]  ;;  %v3270_v11 = vpack.c.bf16 %v144_v4, %v141_v52 }
 0x1ea   :  { %572 = vmatprep.subr.bf16.mxu1 %v3211_v28  ;;  %2253 = vmatprep.subr.bf16.mxu0 %v4246_v24  ;;  %v3261_v42 = vpack.c.bf16 %v137_v60, %v134_v62  ;;  %v140_v28 = vld [vmem:[%s4169_s7 + $0xc0] sm:$0xff]  ;;  %v142_v62 = vld [vmem:[%s4169_s7 + $0xd0] sm:$0xff]  ;;  %v145_v60 = vld [vmem:[%s4169_s7 + $0xe8] sm:$0xff] }
 0x1eb   :  { %4254 = vst [vmem:[#allocation20_spill] sm:$0xff] %v3270_v11  ;;  %v3291_v4 = vpack.c.bf16 %v145_v60, %v142_v62  ;;  %v153_v62 = vld [vmem:[%s4169_s7 + $0x128] sm:$0xff]  ;;  %v156_v60 = vld [vmem:[%s4169_s7 + $0x140] sm:$0xff] }
 0x1ec   :  { %4252 = vst [vmem:[#allocation18_spill] sm:$0xff] %v3261_v42 }
 0x1ed   :  { %573 = vmatpush1.bf16.msra.mxu1 %v3233_v47  ;;  %2254 = vmatpush3.bf16.msra.mxu0 %v3235_v29  ;;  %v143_v47 = vld [vmem:[%s4169_s7 + $0xd8] sm:$0xff]  ;;  %4256 = vst [vmem:[#allocation22_spill] sm:$0xff] %v3291_v4  ;;  %v3298_v29 = vpack.c.bf16 %v150_v63, %v147_v18 }
 0x1ee   :  { %574 = vmatprep.subr.bf16.mxu1 %v3242_v7  ;;  %2255 = vmatprep.subr.bf16.mxu0 %v4246_v24  ;;  %v3289_v52 = vpack.c.bf16 %v143_v47, %v140_v28  ;;  %v146_v7 = vld [vmem:[%s4169_s7 + $0xf0] sm:$0xff]  ;;  %v148_v28 = vld [vmem:[%s4169_s7 + $0x100] sm:$0xff]  ;;  %v151_v47 = vld [vmem:[%s4169_s7 + $0x118] sm:$0xff] }
 0x1ef   :  { %4257 = vst [vmem:[#allocation23_spill] sm:$0xff] %v3298_v29  ;;  %v3319_v63 = vpack.c.bf16 %v151_v47, %v148_v28  ;;  %v159_v28 = vld [vmem:[%s4169_s7 + $0x158] sm:$0xff]  ;;  %v162_v47 = vld [vmem:[%s4169_s7 + $0x170] sm:$0xff] }
 0x1f0   :  { %4255 = vst [vmem:[#allocation21_spill] sm:$0xff] %v3289_v52 }
 0x1f1   :  { %575 = vmatpush1.bf16.msra.mxu1 %v3261_v42  ;;  %2256 = vmatpush3.bf16.msra.mxu0 %v3263_v34  ;;  %v149_v42 = vld [vmem:[%s4169_s7 + $0x108] sm:$0xff]  ;;  %4259 = vst [vmem:[#allocation25_spill] sm:$0xff] %v3319_v63  ;;  %v3326_v34 = vpack.c.bf16 %v156_v60, %v153_v62 }
 0x1f2   :  { %576 = vmatprep.subr.bf16.mxu1 %v3270_v11  ;;  %2257 = vmatprep.subr.bf16.mxu0 %v4246_v24  ;;  %v3317_v18 = vpack.c.bf16 %v149_v42, %v146_v7  ;;  %v152_v11 = vld [vmem:[%s4169_s7 + $0x120] sm:$0xff]  ;;  %v154_v7 = vld [vmem:[%s4169_s7 + $0x130] sm:$0xff]  ;;  %v157_v42 = vld [vmem:[%s4169_s7 + $0x148] sm:$0xff] }
 0x1f3   :  { %4260 = vst [vmem:[#allocation26_spill] sm:$0xff] %v3326_v34  ;;  %v3347_v60 = vpack.c.bf16 %v157_v42, %v154_v7  ;;  %v262_v7 = vld [vmem:[%s4171_s9 + $0x8] sm:$0xff]  ;;  %v265_v42 = vld [vmem:[%s4171_s9 + $0x20] sm:$0xff] }
 0x1f4   :  { %4258 = vst [vmem:[#allocation24_spill] sm:$0xff] %v3317_v18 }
 0x1f5   :  { %577 = vmatpush1.bf16.msra.mxu1 %v3289_v52  ;;  %2258 = vmatpush3.bf16.msra.mxu0 %v3291_v4  ;;  %v155_v52 = vld [vmem:[%s4169_s7 + $0x138] sm:$0xff]  ;;  %4262 = vst [vmem:[#allocation28_spill] sm:$0xff] %v3347_v60  ;;  %v3354_v4 = vpack.c.bf16 %v162_v47, %v159_v28 }
 0x1f6   :  { %578 = vmatprep.subr.bf16.mxu1 %v3298_v29  ;;  %2259 = vmatprep.subr.bf16.mxu0 %v4246_v24  ;;  %v3345_v62 = vpack.c.bf16 %v155_v52, %v152_v11  ;;  %v158_v29 = vld [vmem:[%s4169_s7 + $0x150] sm:$0xff]  ;;  %v160_v11 = vld [vmem:[%s4169_s7 + $0x160] sm:$0xff]  ;;  %v163_v52 = vld [vmem:[%s4169_s7 + $0x178] sm:$0xff] }
 0x1f7   :  { %4263 = vst [vmem:[#allocation29_spill] sm:$0xff] %v3354_v4  ;;  %v3375_v47 = vpack.c.bf16 %v163_v52, %v160_v11  ;;  %v268_v11 = vld [vmem:[%s4171_s9 + $0x38] sm:$0xff]  ;;  %v271_v52 = vld [vmem:[%s4171_s9 + $0x50] sm:$0xff] }
 0x1f8   :  { %4261 = vst [vmem:[#allocation27_spill] sm:$0xff] %v3345_v62 }
 0x1f9   :  { %579 = vmatpush1.bf16.msra.mxu1 %v3317_v18  ;;  %2260 = vmatpush3.bf16.msra.mxu0 %v3319_v63  ;;  %v161_v18 = vld [vmem:[%s4169_s7 + $0x168] sm:$0xff]  ;;  %4264 = vst [vmem:[#allocation30_spill] sm:$0xff] %v3375_v47  ;;  %v3382_v63 = vpack.c.bf16 %v265_v42, %v262_v7  ;;  %v267_v42 = vld [vmem:[%s4171_s9 + $0x30] sm:$0xff] }
 0x1fa   :  { %580 = vmatprep.subr.bf16.mxu1 %v3326_v34  ;;  %2261 = vmatprep.subr.bf16.mxu0 %v4246_v24  ;;  %v3373_v28 = vpack.c.bf16 %v161_v18, %v158_v29  ;;  %v261_v34 = vld [vmem:[%s4171_s9] sm:$0xff]  ;;  %v263_v29 = vld [vmem:[%s4171_s9 + $0x10] sm:$0xff]  ;;  %v266_v18 = vld [vmem:[%s4171_s9 + $0x28] sm:$0xff] }
 0x1fb   :  { %4265 = vst [vmem:[#allocation31_spill] sm:$0xff] %v3382_v63 }
 0x1fd   :  { %581 = vmatpush1.bf16.msra.mxu1 %v3345_v62  ;;  %2262 = vmatpush3.bf16.msra.mxu0 %v3347_v60  ;;  %v264_v62 = vld [vmem:[%s4171_s9 + $0x18] sm:$0xff]  ;;  %v3409_v60 = vpack.c.bf16 %v271_v52, %v268_v11  ;;  %v3430_v11 = vpack.c.bf16 %v270_v5, %v267_v42  ;;  %v273_v52 = vld [vmem:[%s4171_s9 + $0x60] sm:$0xff]  ;;  %v275_v5 = vld [vmem:[%s4171_s9 + $0x70] sm:$0xff] }
 0x1fe   :  { %582 = vmatprep.subr.bf16.mxu1 %v3354_v4  ;;  %2263 = vmatprep.subr.bf16.mxu0 %v4246_v24  ;;  %v3401_v7 = vpack.c.bf16 %v264_v62, %v261_v34  ;;  %v3406_v4 = vpack.c.bf16 %v266_v18, %v263_v29  ;;  %v269_v34 = vld [vmem:[%s4171_s9 + $0x40] sm:$0xff]  ;;  %v272_v62 = vld [vmem:[%s4171_s9 + $0x58] sm:$0xff]  ;;  %v274_v29 = vld [vmem:[%s4171_s9 + $0x68] sm:$0xff] }
 0x1ff   :  { %4268 = vst [vmem:[#allocation34_spill] sm:$0xff] %v3409_v60  ;;  %v277_v18 = vld [vmem:[%s4171_s9 + $0x80] sm:$0xff]  ;;  %4269 = vst [vmem:[#allocation35_spill] sm:$0xff] %v3430_v11  ;;  %v278_v42 = vld [vmem:[%s4171_s9 + $0x88] sm:$0xff] }
 0x200   :  { %4266 = vst [vmem:[#allocation32_spill] sm:$0xff] %v3401_v7  ;;  %4267 = vst [vmem:[#allocation33_spill] sm:$0xff] %v3406_v4 }
 0x201   :  { %583 = vmatpush1.bf16.msra.mxu1 %v3373_v28  ;;  %2264 = vmatpush3.bf16.msra.mxu0 %v3375_v47  ;;  %v3439_v47 = vpack.c.bf16 %v277_v18, %v274_v29  ;;  %v279_v18 = vld [vmem:[%s4171_s9 + $0x90] sm:$0xff] }
 0x202   :  { %690 = vmatprep.subr.bf16.mxu1 %v3382_v63  ;;  %2269 = vmatprep.subr.bf16.mxu0 %v4246_v24  ;;  %v3436_v63 = vpack.c.bf16 %v272_v62, %v269_v34  ;;  %v280_v34 = vld [vmem:[%s4171_s9 + $0x98] sm:$0xff]  ;;  %v283_v62 = vld [vmem:[%s4171_s9 + $0xb0] sm:$0xff] }
 0x203   :  { %4271 = vst [vmem:[#allocation37_spill] sm:$0xff] %v3439_v47 }
 0x204   :  { %601 = vmatmul.mubr.bf16.vlgmr.msra.gmra.mrb[8].mxu1 %v3156_v35  ;;  %2266 = vmatmul.mubr.bf16.vlgmr.msra.gmra.mrb[8].mxu0 %v3156_v35  ;;  %4270 = vst [vmem:[#allocation36_spill] sm:$0xff] %v3436_v63  ;;  %v276_v35 = vld [vmem:[%s4171_s9 + $0x78] sm:$0xff] }
 0x205   :  { %691 = vmatpush1.bf16.msra.mxu1 %v3401_v7  ;;  %2270 = vmatpush3.bf16.msra.mxu0 %v3406_v4  ;;  %v3461_v29 = vpack.c.bf16 %v276_v35, %v273_v52  ;;  %v3470_v4 = vpack.c.bf16 %v283_v62, %v280_v34  ;;  %v282_v7 = vld [vmem:[%s4171_s9 + $0xa8] sm:$0xff]  ;;  %v281_v52 = vld [vmem:[%s4171_s9 + $0xa0] sm:$0xff]  ;;  %v284_v35 = vld [vmem:[%s4171_s9 + $0xb8] sm:$0xff] }
 0x206   :  { %692 = vmatprep.subr.bf16.mxu1 %v3409_v60  ;;  %2271 = vmatprep.subr.bf16.mxu0 %v4246_v24  ;;  %v3467_v60 = vpack.c.bf16 %v278_v42, %v275_v5  ;;  %v286_v5 = vld [vmem:[%s4171_s9 + $0xc8] sm:$0xff]  ;;  %v289_v42 = vld [vmem:[%s4171_s9 + $0xe0] sm:$0xff]  ;;  %v3489_v34 = vpack.c.bf16 %v282_v7, %v279_v18  ;;  %v287_v7 = vld [vmem:[%s4171_s9 + $0xd0] sm:$0xff] }
 0x207   :  { %722 = vmatprep.mubr.bf16.mxu1 %v4248_v46  ;;  %2285 = vmatprep.mubr.msk.bf16.mxu0 %vm2611_vm0, %v4246_v24  ;;  %4272 = vst [vmem:[#allocation38_spill] sm:$0xff] %v3461_v29  ;;  %4274 = vst [vmem:[#allocation40_spill] sm:$0xff] %v3470_v4  ;;  %v285_v62 = vld [vmem:[%s4171_s9 + $0xc0] sm:$0xff]  ;;  %v290_v18 = vld [vmem:[%s4171_s9 + $0xe8] sm:$0xff] }
 0x208   :  { %4273 = vst [vmem:[#allocation39_spill] sm:$0xff] %v3467_v60  ;;  %4275 = vst [vmem:[#allocation41_spill] sm:$0xff] %v3489_v34 }
 0x209   :  { %693 = vmatpush1.bf16.msra.mxu1 %v3430_v11  ;;  %2272 = vmatpush3.bf16.msra.mxu0 %v3436_v63  ;;  %v3498_v63 = vpack.c.bf16 %v289_v42, %v286_v5  ;;  %v288_v11 = vld [vmem:[%s4171_s9 + $0xd8] sm:$0xff]  ;;  %v291_v42 = vld [vmem:[%s4171_s9 + $0xf0] sm:$0xff] }
 0x20a   :  { %694 = vmatprep.subr.bf16.mxu1 %v3439_v47  ;;  %2273 = vmatprep.subr.bf16.mxu0 %v4246_v24  ;;  %v3495_v47 = vpack.c.bf16 %v284_v35, %v281_v52  ;;  %v292_v52 = vld [vmem:[%s4171_s9 + $0xf8] sm:$0xff]  ;;  %v295_v35 = vld [vmem:[%s4171_s9 + $0x110] sm:$0xff]  ;;  %v3517_v5 = vpack.c.bf16 %v288_v11, %v285_v62  ;;  %v293_v11 = vld [vmem:[%s4171_s9 + $0x100] sm:$0xff] }
 0x20b   :  { %4277 = vst [vmem:[#allocation43_spill] sm:$0xff] %v3498_v63  ;;  %v296_v62 = vld [vmem:[%s4171_s9 + $0x118] sm:$0xff] }
 0x20c   :  { %4276 = vst [vmem:[#allocation42_spill] sm:$0xff] %v3495_v47  ;;  %4278 = vst [vmem:[#allocation44_spill] sm:$0xff] %v3517_v5 }
 0x20d   :  { %695 = vmatpush1.bf16.msra.mxu1 %v3461_v29  ;;  %2274 = vmatpush3.bf16.msra.mxu0 %v3467_v60  ;;  %v3526_v60 = vpack.c.bf16 %v295_v35, %v292_v52  ;;  %v294_v29 = vld [vmem:[%s4171_s9 + $0x108] sm:$0xff]  ;;  %v297_v35 = vld [vmem:[%s4171_s9 + $0x120] sm:$0xff] }
 0x20e   :  { %696 = vmatprep.subr.bf16.mxu1 %v3470_v4  ;;  %2275 = vmatprep.subr.bf16.mxu0 %v4246_v24  ;;  %v3523_v4 = vpack.c.bf16 %v290_v18, %v287_v7  ;;  %v298_v7 = vld [vmem:[%s4171_s9 + $0x128] sm:$0xff]  ;;  %v301_v18 = vld [vmem:[%s4171_s9 + $0x140] sm:$0xff]  ;;  %v3545_v52 = vpack.c.bf16 %v294_v29, %v291_v42  ;;  %v299_v29 = vld [vmem:[%s4171_s9 + $0x130] sm:$0xff] }
 0x20f   :  { %4280 = vst [vmem:[#allocation46_spill] sm:$0xff] %v3526_v60  ;;  %v302_v42 = vld [vmem:[%s4171_s9 + $0x148] sm:$0xff] }
 0x210   :  { %4279 = vst [vmem:[#allocation45_spill] sm:$0xff] %v3523_v4 }
 0x211   :  { %697 = vmatpush1.bf16.msra.mxu1 %v3489_v34  ;;  %2276 = vmatpush3.bf16.msra.mxu0 %v3495_v47  ;;  %v3554_v47 = vpack.c.bf16 %v301_v18, %v298_v7  ;;  %v300_v34 = vld [vmem:[%s4171_s9 + $0x138] sm:$0xff]  ;;  %v303_v18 = vld [vmem:[%s4171_s9 + $0x150] sm:$0xff] }
 0x212   :  { %698 = vmatprep.subr.bf16.mxu1 %v3498_v63  ;;  %2277 = vmatprep.subr.bf16.mxu0 %v4246_v24  ;;  %v3551_v63 = vpack.c.bf16 %v296_v62, %v293_v11  ;;  %v304_v11 = vld [vmem:[%s4171_s9 + $0x158] sm:$0xff]  ;;  %v307_v62 = vld [vmem:[%s4171_s9 + $0x170] sm:$0xff]  ;;  %v3573_v7 = vpack.c.bf16 %v300_v34, %v297_v35  ;;  %v305_v34 = vld [vmem:[%s4171_s9 + $0x160] sm:$0xff] }
 0x213   :  { %v308_v35 = vld [vmem:[%s4171_s9 + $0x178] sm:$0xff] }
 0x215   :  { %699 = vmatpush1.bf16.msra.mxu1 %v3517_v5  ;;  %2278 = vmatpush3.bf16.msra.mxu0 %v3523_v4  ;;  %v3582_v4 = vpack.c.bf16 %v307_v62, %v304_v11  ;;  %v306_v5 = vld [vmem:[%s4171_s9 + $0x168] sm:$0xff]  ;;  %s2046_s9 = sshll.u32 %s2613_s26, 4  ;;  %s2047_s9 = int_to_ptr.vmem [resolvable:$true] %s2046_s9 }
 0x216   :  { %700 = vmatprep.subr.bf16.mxu1 %v3526_v60  ;;  %2279 = vmatprep.subr.bf16.mxu0 %v4246_v24  ;;  %v3579_v60 = vpack.c.bf16 %v302_v42, %v299_v29  ;;  %v3595_v29 = vpack.c.bf16 %v306_v5, %v303_v18  ;;  %v3598_v42 = vpack.c.bf16 %v308_v35, %v305_v34  ;;  %p2590_p1 = scmp.lt.s32.totalorder %s2047_s9, %s2047_s9 }
 0x219   :  { %701 = vmatpush1.bf16.msra.mxu1 %v3545_v52  ;;  %2280 = vmatpush3.bf16.msra.mxu0 %v3551_v63 }
 0x21a   :  { %702 = vmatprep.subr.bf16.mxu1 %v3554_v47  ;;  %2281 = vmatprep.subr.bf16.mxu0 %v4246_v24 }
 0x21d   :  { %703 = vmatpush1.bf16.msra.mxu1 %v3573_v7  ;;  %2282 = vmatpush3.bf16.msra.mxu0 %v3579_v60 }
 0x21e   :  { %704 = vmatprep.subr.bf16.mxu1 %v3582_v4  ;;  %2283 = vmatprep.subr.bf16.mxu0 %v4246_v24 }
 0x221   :  { %705 = vmatpush1.bf16.msra.mxu1 %v3595_v29  ;;  %2284 = vmatpush3.bf16.msra.mxu0 %v3598_v42 }
 0x222   :  { %817 = vmatprep.subr.bf16.mxu1 %v2718_v3  ;;  %2289 = vmatprep.subr.bf16.mxu0 %v4246_v24 }
 0x224   :  { %723 = vmatmul.mubr.bf16.vlgmr.msra.gmra.mrb[8].mxu1 %v2867_v51  ;;  %2286 = vmatmul.mubr.bf16.vlgmr.msra.gmra.mrb[12].mxu0 %v2867_v51 }
 0x225   :  { %818 = vmatpush1.bf16.msra.mxu1 %v2731_v8  ;;  %849 = vmatprep.mubr.bf16.mxu1 %v4248_v46 }
 0x226   :  { %819 = vmatprep.subr.bf16.mxu1 %v2733_v9  ;;  %2291 = vmatprep.mubr.msk.bf16.mxu0 %vm2611_vm0, %v4246_v24 }
 0x229   :  { %820 = vmatpush1.bf16.msra.mxu1 %v2750_v14 }
 0x22a   :  { %821 = vmatprep.subr.bf16.mxu1 %v2753_v15 }
 0x22d   :  { %822 = vmatpush1.bf16.msra.mxu1 %v2768_v20 }
 0x22e   :  { %823 = vmatprep.subr.bf16.mxu1 %v2771_v21 }
 0x231   :  { %824 = vmatpush1.bf16.msra.mxu1 %v2786_v26 }
 0x232   :  { %825 = vmatprep.subr.bf16.mxu1 %v2789_v27 }
 0x235   :  { %826 = vmatpush1.bf16.msra.mxu1 %v2804_v32 }
 0x236   :  { %827 = vmatprep.subr.bf16.mxu1 %v2807_v33  ;;  %v333_v33 = vld [vmem:[%s4172_s10] sm:$0x7] }
 0x239   :  { %828 = vmatpush1.bf16.msra.mxu1 %v2822_v38  ;;  %v260_v38 = vld [vmem:[%s4170_s8] sm:$0x7] }
 0x23a   :  { %829 = vmatprep.subr.bf16.mxu1 %v2825_v39  ;;  %v656_v39 = vrot.slane %v260_v38, %v2931_v10 }
 0x23d   :  { %830 = vmatpush1.bf16.msra.mxu1 %v2840_v44  ;;  %v678_v44 = vrot.slane %v333_v33, %v2931_v10 }
 0x23e   :  { %831 = vmatprep.subr.bf16.mxu1 %v2843_v45  ;;  %v660_v45 = vrot.slane %v260_v38, %v2937_v12 }
 0x23f   :  { %v3637_v51 = vadd.f32 %v678_v44, %v656_v39 }
 0x241   :  { %832 = vmatpush1.bf16.msra.mxu1 %v2852_v48  ;;  %v682_v48 = vrot.slane %v333_v33, %v2937_v12 }
 0x242   :  { %946 = vmatprep.subr.bf16.mxu1 %v2964_v40 }
 0x243   :  { %v3639_v40 = vadd.f32 %v682_v48, %v660_v45 }
 0x2b7   :  { %v561_v3 = vpop.f32.mrb[4].mxu0 }
 0x2b8   :  { %v2247_v8 = vpop.f32.mrb[5].mxu0 }
 0x2b9   :  { %v564_v9 = vpop.f32.mrb[6].mxu0 }
 0x2ba   :  { %v2248_v14 = vpop.f32.mrb[7].mxu0 }
 0x2d7   :  { %v645_v15 = vpop.f32.mrb[8].mxu0 }
 0x2d8   :  { %v646_v20 = vadd.f32 %v645_v15, %v561_v3  ;;  %v2267_v21 = vpop.f32.mrb[9].mxu0 }
 0x2d9   :  { %v648_v26 = vpop.f32.mrb[10].mxu0 }
 0x2da   :  { %v649_v27 = vadd.f32 %v648_v26, %v564_v9  ;;  %v2268_v32 = vpop.f32.mrb[11].mxu0 }
 0x2f7   :  { %v724_v5 = vpop.f32.mrb[8].mxu1  ;;  %v767_v11 = vpop.f32.mrb[12].mxu0 }
 0x2f8   :  { %v2491_v62 = vadd.f32 %v3637_v51, %v724_v5  ;;  %v726_v18 = vpop.f32.mrb[9].mxu1  ;;  %v2287_v34 = vpop.f32.mrb[13].mxu0  ;;  %v663_v5 = vsub.s32 2, %v2928_v6 }
 0x2f9   :  { %v2493_v35 = vadd.f32 %v3639_v40, %v726_v18  ;;  %v728_v3 = vpop.f32.mrb[10].mxu1  ;;  %v770_v8 = vpop.f32.mrb[14].mxu0 }
 0x2fa   :  { %v2056_v9 = vmul.f32 -1.442695, %v2491_v62  ;;  %v2495_v10 = vadd.f32 %v3637_v51, %v728_v3  ;;  %v730_v14 = vpop.f32.mrb[11].mxu1  ;;  %v2288_v15 = vpop.f32.mrb[15].mxu0  ;;  %v3646_v18 = vrot.slane %v333_v33, %v663_v5 }
 0x2fb   :  { %v2497_v12 = vadd.f32 %v3639_v40, %v730_v14  ;;  %v2058_v26 = vmul.f32 -1.442695, %v2493_v35 }
 0x2fc   :  { %2529 = vpow2.f32 %v2056_v9  ;;  %v2057_v21 = vmul.f32 -1.442695, %v2495_v10  ;;  %v3648_v9 = vrot.slane %v260_v38, %v663_v5  ;;  %v768_v10 = vadd.f32 %v767_v11, %v3646_v18 }
 0x2fd   :  { %v2059_v32 = vmul.f32 -1.442695, %v2497_v12 }
 0x2fe   :  { %2531 = vpow2.f32 %v2057_v21  ;;  %v670_v15 = vadd.f32 %v3648_v9, %v646_v20  ;;  %v771_v21 = vadd.f32 %v770_v8, %v3646_v18 }
 0x2ff   :  { %2533 = vpow2.f32 %v2058_v26 }
 0x300   :  { %2535 = vpow2.f32 %v2059_v32  ;;  %v673_v32 = vadd.f32 %v3648_v9, %v649_v27 }
 0x306   :  { %v2530_v39 = vpop.eup %2529 }
 0x307   :  { %v782_v44 = vadd.f32 1.0, %v2530_v39 }
 0x308   :  { %v2532_v45 = vpop.eup %2531 }
 0x309   :  { %2537 = vrcp.f32 %v782_v44  ;;  %v783_v48 = vadd.f32 1.0, %v2532_v45  ;;  %v2534_v62 = vpop.eup %2533 }
 0x30a   :  { %v2536_v34 = vpop.eup %2535  ;;  %v796_v3 = vadd.f32 1.0, %v2534_v62 }
 0x30b   :  { %2539 = vrcp.f32 %v783_v48  ;;  %v797_v35 = vadd.f32 1.0, %v2536_v34 }
 0x30c   :  { %2541 = vrcp.f32 %v796_v3 }
 0x30d   :  { %2543 = vrcp.f32 %v797_v35 }
 0x313   :  { %v2538_v14 = vpop.eup %2537 }
 0x314   :  { %v802_v12 = vmul.f32 %v2538_v14, %v768_v10 }
 0x315   :  { %v2540_v26 = vpop.eup %2539 }
 0x316   :  { %v804_v33 = vadd.f32 %v802_v12, %v670_v15  ;;  %v803_v39 = vmul.f32 %v2540_v26, %v771_v21  ;;  %v2542_v38 = vpop.eup %2541  ;;  %v4285_v21 = vld [vmem:[#allocation9_spill] sm:$0xff]  ;;  %v4286_v26 = vld [vmem:[#allocation10_spill] sm:$0xff] }
 0x317   :  { %v2544_v45 = vpop.eup %2543  ;;  %v808_v48 = vsub.f32 1.0, %v2542_v38 }
 0x318   :  { %2545 = vtanh.f32 %v804_v33  ;;  %v805_v44 = vadd.f32 %v803_v39, %v673_v32  ;;  %v809_v11 = vsub.f32 1.0, %v2544_v45  ;;  %v4287_v32 = vld [vmem:[#allocation11_spill] sm:$0xff]  ;;  %v4288_v33 = vld [vmem:[#allocation12_spill] sm:$0xff]  ;;  %v4289_v39 = vld [vmem:[#allocation13_spill] sm:$0xff] }
 0x319   :  { %v810_v62 = vmul.f32 %v808_v48, %v2857_v49  ;;  %v4293_v48 = vld [vmem:[#allocation17_spill] sm:$0xff] }
 0x31a   :  { %2547 = vtanh.f32 %v805_v44  ;;  %v811_v3 = vmul.f32 %v809_v11, %v2862_v50  ;;  %v4290_v44 = vld [vmem:[#allocation14_spill] sm:$0xff] }
 0x31b   :  { %v4294_v11 = vld [vmem:[#allocation18_spill] sm:$0xff] }
 0x322   :  { %v2546_v5 = vpop.eup %2545 }
 0x323   :  { %v812_v20 = vmul.f32 %v2546_v5, %v2542_v38  ;;  %v4291_v38 = vld [vmem:[#allocation15_spill] sm:$0xff] }
 0x324   :  { %v2548_v34 = vpop.eup %2547  ;;  %v4295_v5 = vld [vmem:[#allocation19_spill] sm:$0xff] }
 0x325   :  { %v813_v8 = vmul.f32 %v2548_v34, %v2544_v45  ;;  %v3656_v35 = vadd.f32 %v812_v20, %v810_v62  ;;  %v4292_v45 = vld [vmem:[#allocation16_spill] sm:$0xff]  ;;  %v4297_v20 = vld [vmem:[#allocation21_spill] sm:$0xff]  ;;  %v4298_v34 = vld [vmem:[#allocation22_spill] sm:$0xff] }
 0x326   :  { %v4296_v62 = vld [vmem:[#allocation20_spill] sm:$0xff] }
 0x327   :  { %v3658_v27 = vadd.f32 %v813_v8, %v811_v3  ;;  %v4299_v3 = vld [vmem:[#allocation23_spill] sm:$0xff]  ;;  %v4300_v8 = vld [vmem:[#allocation24_spill] sm:$0xff] }
 0x329   :  { %v3662_v10 = vpack.c.bf16 %v3658_v27, %v3656_v35 }
 0x32b   :  { %850 = vmatmul.mubr.bf16.vlgmr.msra.gmra.mrb[12].mxu1 %v3662_v10 }
 0x32c   :  { %947 = vmatpush1.bf16.msra.mxu1 %v2991_v56  ;;  %978 = vmatprep.mubr.bf16.mxu1 %v4248_v46 }
 0x32d   :  { %948 = vmatprep.subr.bf16.mxu1 %v2993_v57 }
 0x330   :  { %949 = vmatpush1.bf16.msra.mxu1 %v3010_v1 }
 0x331   :  { %950 = vmatprep.subr.bf16.mxu1 %v3014_v2 }
 0x334   :  { %951 = vmatpush1.bf16.msra.mxu1 %v3029_v22 }
 0x335   :  { %952 = vmatprep.subr.bf16.mxu1 %v3032_v23 }
 0x338   :  { %953 = vmatpush1.bf16.msra.mxu1 %v3047_v30 }
 0x339   :  { %954 = vmatprep.subr.bf16.mxu1 %v3050_v31 }
 0x33c   :  { %955 = vmatpush1.bf16.msra.mxu1 %v3059_v36  ;;  %v3736_v36 = vld [vmem:[%s4165_s3 + $0x18] sm:$0xff] }
 0x33d   :  { %956 = vmatprep.subr.bf16.mxu1 %v3069_v43 }
 0x340   :  { %957 = vmatpush1.bf16.msra.mxu1 %v3080_v59 }
 0x341   :  { %958 = vmatprep.subr.bf16.mxu1 %v3096_v16 }
 0x344   :  { %959 = vmatpush1.bf16.msra.mxu1 %v3108_v25 }
 0x345   :  { %960 = vmatprep.subr.bf16.mxu1 %v3124_v41 }
 0x348   :  { %961 = vmatpush1.bf16.msra.mxu1 %v3136_v53 }
 0x349   :  { %1030 = vmatprep.subr.bf16.mxu1 %v3152_v19 }
 0x3fe   :  { %v851_v49 = vpop.f32.mrb[12].mxu1 }
 0x3ff   :  { %v853_v50 = vpop.f32.mrb[13].mxu1  ;;  %v852_v57 = vadd.f32 %v851_v49, %v2940_v13  ;;  %v4301_v49 = vld [vmem:[#allocation25_spill] sm:$0xff] }
 0x400   :  { %v855_v56 = vpop.f32.mrb[14].mxu1  ;;  %v854_v22 = vadd.f32 %v853_v50, %v2943_v17  ;;  %v4302_v50 = vld [vmem:[#allocation26_spill] sm:$0xff] }
 0x401   :  { %v856_v1 = vadd.f32 %v855_v56, %v2940_v13  ;;  %v857_v2 = vpop.f32.mrb[15].mxu1  ;;  %v4281_v13 = vld [vmem:[#allocation5_spill] sm:$0xff]  ;;  %v4303_v56 = vld [vmem:[#allocation27_spill] sm:$0xff] }
 0x402   :  { %v858_v23 = vadd.f32 %v857_v2, %v2943_v17  ;;  %v4283_v17 = vld [vmem:[#allocation7_spill] sm:$0xff]  ;;  %v4306_v2 = vld [vmem:[#allocation30_spill] sm:$0xff] }
 0x403   :  { %v860_v30 = vpack.c.bf16 %v856_v1, %v852_v57  ;;  %v4304_v57 = vld [vmem:[#allocation28_spill] sm:$0xff]  ;;  %v4305_v1 = vld [vmem:[#allocation29_spill] sm:$0xff] }
 0x404   :  { %v902_v31 = vpack.c.bf16 %v858_v23, %v854_v22  ;;  %v4307_v22 = vld [vmem:[#allocation31_spill] sm:$0xff]  ;;  %v4308_v23 = vld [vmem:[#allocation32_spill] sm:$0xff] }
 0x405   :  { %2290 = vmatpush3.bf16.msra.mxu0 %v860_v30  ;;  %v4309_v30 = vld [vmem:[#allocation33_spill] sm:$0xff] }
 0x406   :  { %2295 = vmatprep.subr.bf16.mxu0 %v4246_v24 }
 0x408   :  { %2292 = vmatmul.mubr.msk.bf16.vlgmr.msra.gmra.mrb[16].mxu0 %vm392_vm1, %v2961_v37  ;;  %v3724_v37 = vld [vmem:[%s4165_s3] sm:$0xff] }
 0x409   :  { %2296 = vmatpush3.bf16.msra.mxu0 %v902_v31  ;;  %2297 = vmatprep.mubr.msk.bf16.mxu0 %vm2611_vm0, %v4246_v24  ;;  %v4310_v31 = vld [vmem:[#allocation34_spill] sm:$0xff] }
 0x40a   :  { %2301 = vmatprep.subr.bf16.mxu0 %v4246_v24 }
 0x410   :  { %2298 = vmatmul.mubr.msk.bf16.vlgmr.msra.gmra.mrb[20].mxu0 %vm392_vm1, %v2989_v54  ;;  %v3729_v54 = vld [vmem:[%s4165_s3 + $0x10] sm:$0xff] }
 0x411   :  { %2302 = vmatpush3.bf16.msra.mxu0 %v2883_v55  ;;  %2317 = vmatprep.mubr.msk.bf16.mxu0 %vm2611_vm0, %v4246_v24  ;;  %v4282_v55 = vld [vmem:[#allocation6_spill] sm:$0xff] }
 0x412   :  { %2303 = vmatprep.subr.bf16.mxu0 %v4246_v24 }
 0x415   :  { %2304 = vmatpush3.bf16.msra.mxu0 %v2893_v58  ;;  %v4284_v58 = vld [vmem:[#allocation8_spill] sm:$0xff] }
 0x416   :  { %2305 = vmatprep.subr.bf16.mxu0 %v4246_v24 }
 0x419   :  { %2306 = vmatpush3.bf16.msra.mxu0 %v2903_v61  ;;  %v1373_v61 = vld [vmem:[%s4166_s4] sm:$0xf] }
 0x41a   :  { %2307 = vmatprep.subr.bf16.mxu0 %v4246_v24  ;;  %1375 = vperm.xlu0 %2527, %v1373_v61   ;;  %v4316_v61 = vld [vmem:[#allocation40_spill] sm:$0xff] }
 0x41d   :  { %2308 = vmatpush3.bf16.msra.mxu0 %v2913_v0  ;;  %v3718_v0 = vld [vmem:[%s4165_s3 + $0x8] sm:$0xff] }
 0x41e   :  { %2309 = vmatprep.subr.bf16.mxu0 %v4246_v24  ;;  %1256 = vperm.xlu1 %2528, %v3718_v0  }
 0x41f   :  { %1253 = vperm.xlu0 %2527, %v3724_v37  }
 0x421   :  { %2310 = vmatpush3.bf16.msra.mxu0 %v4281_v13  ;;  %v4312_v13 = vld [vmem:[#allocation36_spill] sm:$0xff] }
 0x422   :  { %2311 = vmatprep.subr.bf16.mxu0 %v4246_v24  ;;  %1259 = vperm.xlu1 %2528, %v3729_v54  }
 0x423   :  { %1262 = vperm.xlu0 %2527, %v3736_v36  }
 0x425   :  { %2312 = vmatpush3.bf16.msra.mxu0 %v4282_v55  ;;  %v4313_v55 = vld [vmem:[#allocation37_spill] sm:$0xff] }
 0x426   :  { %2313 = vmatprep.subr.bf16.mxu0 %v4246_v24 }
 0x429   :  { %2314 = vmatpush3.bf16.msra.mxu0 %v4283_v17  ;;  %v4314_v17 = vld [vmem:[#allocation38_spill] sm:$0xff] }
 0x42a   :  { %2315 = vmatprep.subr.bf16.mxu0 %v4246_v24 }
 0x42d   :  { %2316 = vmatpush3.bf16.msra.mxu0 %v4284_v58  ;;  %v4315_v58 = vld [vmem:[#allocation39_spill] sm:$0xff] }
 0x42e   :  { %2321 = vmatprep.subr.bf16.mxu0 %v4246_v24 }
 0x4db   :  { %v895_v43 = vpop.f32.mrb[16].mxu0 }
 0x4dc   :  { %v2293_v59 = vpop.f32.mrb[17].mxu0 }
 0x4dd   :  { %v898_v16 = vpop.f32.mrb[18].mxu0  ;;  %v4319_v59 = vld [vmem:[#allocation43_spill] sm:$0xff] }
 0x4de   :  { %v944_v25 = vpack.c.bf16 %v898_v16, %v895_v43  ;;  %v2294_v41 = vpop.f32.mrb[19].mxu0  ;;  %v4318_v43 = vld [vmem:[#allocation42_spill] sm:$0xff]  ;;  %v4320_v16 = vld [vmem:[#allocation44_spill] sm:$0xff] }
 0x4df   :  { %v4322_v41 = vld [vmem:[#allocation46_spill] sm:$0xff] }
 0x4e3   :  { %v937_v53 = vpop.f32.mrb[20].mxu0 }
 0x4e4   :  { %v2299_v19 = vpop.f32.mrb[21].mxu0 }
 0x4e5   :  { %v940_v14 = vpop.f32.mrb[22].mxu0 }
 0x4e6   :  { %v945_v15 = vpack.c.bf16 %v940_v14, %v937_v53  ;;  %v2300_v12 = vpop.f32.mrb[23].mxu0 }
 0x4e8   :  { %979 = vmatmul.mubr.bf16.vlgmr.msra.gmra.mrb[16].mxu1 %v945_v15  ;;  %2318 = vmatmul.mubr.bf16.vlgmr.msra.gmra.mrb[24].mxu0 %v945_v15 }
 0x4e9   :  { %1031 = vmatpush1.bf16.msra.mxu1 %v4285_v21  ;;  %2322 = vmatpush3.bf16.msra.mxu0 %v4286_v26 }
 0x4ea   :  { %1032 = vmatprep.subr.bf16.mxu1 %v4287_v32  ;;  %2323 = vmatprep.subr.bf16.mxu0 %v4246_v24 }
 0x4eb   :  { %1062 = vmatprep.mubr.bf16.mxu1 %v4248_v46  ;;  %2337 = vmatprep.mubr.msk.bf16.mxu0 %vm2611_vm0, %v4246_v24 }
 0x4ed   :  { %1033 = vmatpush1.bf16.msra.mxu1 %v4288_v33  ;;  %2324 = vmatpush3.bf16.msra.mxu0 %v4289_v39 }
 0x4ee   :  { %1034 = vmatprep.subr.bf16.mxu1 %v4290_v44  ;;  %2325 = vmatprep.subr.bf16.mxu0 %v4246_v24 }
 0x4f1   :  { %1035 = vmatpush1.bf16.msra.mxu1 %v4291_v38  ;;  %2326 = vmatpush3.bf16.msra.mxu0 %v4292_v45 }
 0x4f2   :  { %1036 = vmatprep.subr.bf16.mxu1 %v4293_v48  ;;  %2327 = vmatprep.subr.bf16.mxu0 %v4246_v24 }
 0x4f5   :  { %1037 = vmatpush1.bf16.msra.mxu1 %v4294_v11  ;;  %2328 = vmatpush3.bf16.msra.mxu0 %v4295_v5 }
 0x4f6   :  { %1038 = vmatprep.subr.bf16.mxu1 %v4296_v62  ;;  %2329 = vmatprep.subr.bf16.mxu0 %v4246_v24 }
 0x4f9   :  { %1039 = vmatpush1.bf16.msra.mxu1 %v4297_v20  ;;  %2330 = vmatpush3.bf16.msra.mxu0 %v4298_v34 }
 0x4fa   :  { %1040 = vmatprep.subr.bf16.mxu1 %v4299_v3  ;;  %2331 = vmatprep.subr.bf16.mxu0 %v4246_v24 }
 0x4fd   :  { %1041 = vmatpush1.bf16.msra.mxu1 %v4300_v8  ;;  %2332 = vmatpush3.bf16.msra.mxu0 %v4301_v49 }
 0x4fe   :  { %1042 = vmatprep.subr.bf16.mxu1 %v4302_v50  ;;  %2333 = vmatprep.subr.bf16.mxu0 %v4246_v24 }
 0x501   :  { %1043 = vmatpush1.bf16.msra.mxu1 %v4303_v56  ;;  %2334 = vmatpush3.bf16.msra.mxu0 %v4304_v57 }
 0x502   :  { %1044 = vmatprep.subr.bf16.mxu1 %v4305_v1  ;;  %2335 = vmatprep.subr.bf16.mxu0 %v4246_v24 }
 0x505   :  { %1045 = vmatpush1.bf16.msra.mxu1 %v3373_v28  ;;  %2336 = vmatpush3.bf16.msra.mxu0 %v4306_v2  ;;  %v4311_v28 = vld [vmem:[#allocation35_spill] sm:$0xff] }
 0x506   :  { %1120 = vmatprep.subr.bf16.mxu1 %v4307_v22  ;;  %2341 = vmatprep.subr.bf16.mxu0 %v4246_v24 }
 0x508   :  { %1063 = vmatmul.mubr.bf16.vlgmr.msra.gmra.mrb[16].mxu1 %v944_v25  ;;  %2338 = vmatmul.mubr.bf16.vlgmr.msra.gmra.mrb[28].mxu0 %v944_v25  ;;  %v4321_v25 = vld [vmem:[#allocation45_spill] sm:$0xff] }
 0x509   :  { %1121 = vmatpush1.bf16.msra.mxu1 %v4308_v23  ;;  %2342 = vmatpush3.bf16.msra.mxu0 %v4309_v30 }
 0x50a   :  { %1122 = vmatprep.subr.bf16.mxu1 %v4310_v31  ;;  %2343 = vmatprep.subr.bf16.mxu0 %v4246_v24 }
 0x50b   :  { %1152 = vmatprep.mubr.bf16.mxu1 %v4248_v46  ;;  %2357 = vmatprep.mubr.msk.bf16.mxu0 %vm2611_vm0, %v4246_v24  ;;  %v4317_v46 = vld [vmem:[#allocation41_spill] sm:$0xff] }
 0x50d   :  { %1123 = vmatpush1.bf16.msra.mxu1 %v4311_v28  ;;  %2344 = vmatpush3.bf16.msra.mxu0 %v4312_v13 }
 0x50e   :  { %1124 = vmatprep.subr.bf16.mxu1 %v4313_v55  ;;  %2345 = vmatprep.subr.bf16.mxu0 %v4246_v24 }
 0x511   :  { %1125 = vmatpush1.bf16.msra.mxu1 %v4314_v17  ;;  %2346 = vmatpush3.bf16.msra.mxu0 %v4315_v58 }
 0x512   :  { %1126 = vmatprep.subr.bf16.mxu1 %v4316_v61  ;;  %2347 = vmatprep.subr.bf16.mxu0 %v4246_v24 }
 0x515   :  { %1127 = vmatpush1.bf16.msra.mxu1 %v4317_v46  ;;  %2348 = vmatpush3.bf16.msra.mxu0 %v4318_v43 }
 0x516   :  { %1128 = vmatprep.subr.bf16.mxu1 %v4319_v59  ;;  %2349 = vmatprep.subr.bf16.mxu0 %v4246_v24 }
 0x519   :  { %1129 = vmatpush1.bf16.msra.mxu1 %v4320_v16  ;;  %2350 = vmatpush3.bf16.msra.mxu0 %v4321_v25 }
 0x51a   :  { %1130 = vmatprep.subr.bf16.mxu1 %v4322_v41  ;;  %2351 = vmatprep.subr.bf16.mxu0 %v4246_v24  ;;  %v1257_v41 = vpop.permute.xlu1 %1256 }
 0x51d   :  { %1131 = vmatpush1.bf16.msra.mxu1 %v3545_v52  ;;  %2352 = vmatpush3.bf16.msra.mxu0 %v3551_v63  ;;  %v3811_v63 = vpop.permute.xlu0 %1375 }
 0x51e   :  { %1132 = vmatprep.subr.bf16.mxu1 %v3554_v47  ;;  %2353 = vmatprep.subr.bf16.mxu0 %v4246_v24  ;;  %v4323_v47 = vlaneseq }
 0x520   :  { %v3814_v52 = vand.u32 127, %v4323_v47 }
 0x521   :  { %1133 = vmatpush1.bf16.msra.mxu1 %v3573_v7  ;;  %2354 = vmatpush3.bf16.msra.mxu0 %v3579_v60  ;;  %v2612_v60 = vmov 0.0|0.0  }
 0x522   :  { %1134 = vmatprep.subr.bf16.mxu1 %v3582_v4  ;;  %2355 = vmatprep.subr.bf16.mxu0 %v4246_v24  ;;  %v1254_v4 = vpop.permute.xlu0 %1253  ;;  %vm1377_vm3 = vcmp.eq.s32.totalorder %v3811_v63, %v3814_v52  ;;  %vm1265_vm4 = vcmp.eq.s32.totalorder %v1257_v41, %v3814_v52  ;;  %v1530_v63 = vld [vmem:[%s4175_s13 + $0x18] sm:$0xff]  ;;  %v1468_v41 = vld [vmem:[%s4173_s11 + $0x70] sm:$0xff] }
 0x523   :  { %vm1264_vm2 = vcmp.eq.s32.totalorder %v1254_v4, %v3814_v52 }
 0x524   :  { %v2066_v7 = vsel %vm1264_vm2, 1.0, %v4246_v24 }
 0x525   :  { %1135 = vmatpush1.bf16.msra.mxu1 %v3595_v29  ;;  %2356 = vmatpush3.bf16.msra.mxu0 %v3598_v42 }
 0x526   :  { %2481 = vmatprep.subr.bf16.mxu0 %v2612_v60 }
 0x528   :  { %1153 = vmatmul.mubr.bf16.vlgmr.msra.gmra.mrb[16].mxu1 %v3662_v10  ;;  %2358 = vmatmul.mubr.bf16.vlgmr.msra.gmra.mrb[32].mxu0 %v3662_v10 }
 0x529   :  { %2375 = vmatprep.mubr.msk.f32.mxu0 %vm2611_vm0, %v4246_v24  ;;  %2365 = vmatprep.mubr.msk.f32.mxu1 %vm392_vm1, %v2066_v7 }
 0x5bb   :  { %v1023_v29 = vpop.f32.mrb[24].mxu0 }
 0x5bc   :  { %v2319_v42 = vpop.f32.mrb[25].mxu0 }
 0x5bd   :  { %v1026_v10 = vpop.f32.mrb[26].mxu0 }
 0x5be   :  { %v2320_v53 = vpop.f32.mrb[27].mxu0 }
 0x5db   :  { %v1107_v19 = vpop.f32.mrb[28].mxu0 }
 0x5dc   :  { %v1108_v14 = vadd.f32 %v1107_v19, %v1023_v29  ;;  %v2339_v15 = vpop.f32.mrb[29].mxu0  ;;  %v1528_v19 = vld [vmem:[%s4175_s13 + $0x8] sm:$0xff] }
 0x5dd   :  { %v1110_v12 = vpop.f32.mrb[30].mxu0  ;;  %v1260_v15 = vpop.permute.xlu1 %1259 }
 0x5de   :  { %v1111_v21 = vadd.f32 %v1110_v12, %v1026_v10  ;;  %v2340_v26 = vpop.f32.mrb[31].mxu0  ;;  %v1116_v28 = vadd.f32 %v1108_v14, %v3648_v9  ;;  %vm1266_vm5 = vcmp.eq.s32.totalorder %v1260_v15, %v3814_v52 }
 0x5df   :  { %v1529_v26 = vld [vmem:[%s4175_s13 + $0x10] sm:$0xff] }
 0x5e0   :  { %v1119_v58 = vadd.f32 %v1111_v21, %v3648_v9  ;;  %v1527_v9 = vld [vmem:[%s4175_s13] sm:$0xff]  ;;  %v1455_v21 = vld [vmem:[%s4173_s11 + $0x8] sm:$0xff] }
 0x5fb   :  { %v1154_v32 = vpop.f32.mrb[16].mxu1  ;;  %v1197_v33 = vpop.f32.mrb[32].mxu0 }
 0x5fc   :  { %v2499_v39 = vadd.f32 %v3637_v51, %v1154_v32  ;;  %v1156_v44 = vpop.f32.mrb[17].mxu1  ;;  %v2359_v38 = vpop.f32.mrb[33].mxu0  ;;  %v1198_v31 = vadd.f32 %v1197_v33, %v3646_v18  ;;  %v2074_v32 = vsel %vm1377_vm3, 1.0, %v4246_v24  ;;  %v2067_v33 = vsel %vm1265_vm4, 1.0, %v4246_v24 }
 0x5fd   :  { %v2501_v45 = vadd.f32 %v3639_v40, %v1156_v44  ;;  %v1158_v48 = vpop.f32.mrb[18].mxu1  ;;  %v1200_v11 = vpop.f32.mrb[34].mxu0  ;;  %v1456_v38 = vld [vmem:[%s4173_s11 + $0x10] sm:$0xff] }
 0x5fe   :  { %v2062_v5 = vmul.f32 -1.442695, %v2499_v39  ;;  %v2503_v62 = vadd.f32 %v3637_v51, %v1158_v48  ;;  %v1160_v20 = vpop.f32.mrb[19].mxu1  ;;  %v2360_v34 = vpop.f32.mrb[35].mxu0  ;;  %v1201_v55 = vadd.f32 %v1200_v11, %v3646_v18  ;;  %v1457_v48 = vld [vmem:[%s4173_s11 + $0x18] sm:$0xff]  ;;  %v1544_v11 = vpack.c.bf16 %v1530_v63, %v1529_v26 }
 0x5ff   :  { %v2505_v3 = vadd.f32 %v3639_v40, %v1160_v20  ;;  %v2064_v49 = vmul.f32 -1.442695, %v2501_v45  ;;  %v1263_v39 = vpop.permute.xlu0 %1262  ;;  %v2068_v45 = vsel %vm1266_vm5, 1.0, %v4246_v24  ;;  %v1471_v20 = vpack.c.bf16 %v1457_v48, %v1456_v38  ;;  %v1458_v34 = vld [vmem:[%s4173_s11 + $0x20] sm:$0xff] }
 0x600   :  { %2549 = vpow2.f32 %v2062_v5  ;;  %v2063_v8 = vmul.f32 -1.442695, %v2503_v62  ;;  %v1531_v5 = vld [vmem:[%s4175_s13 + $0x20] sm:$0xff]  ;;  %v1532_v62 = vld [vmem:[%s4175_s13 + $0x28] sm:$0xff]  ;;  %vm1267_vm6 = vcmp.eq.s32.totalorder %v1263_v39, %v3814_v52  ;;  %v1617_v63 = vadd.s32 1, %v3814_v52 }
 0x601   :  { %v2065_v50 = vmul.f32 -1.442695, %v2505_v3  ;;  %v1545_v3 = vpack.c.bf16 %v1532_v62, %v1531_v5  ;;  %v1609_v39 = vadd.s32 8, %v2928_v6  ;;  %v1611_v48 = vadd.s32 24, %v2928_v6  ;;  %v2076_v62 = vld [vmem:[%s4174_s12] ss:$0 sm:$0xff] }
 0x602   :  { %2551 = vpow2.f32 %v2063_v8  ;;  %v1459_v8 = vld [vmem:[%s4173_s11 + $0x28] sm:$0xff]  ;;  %vm1648_vm5 = vcmask 1043456  }
 0x603   :  { %2553 = vpow2.f32 %v2064_v49  ;;  %v1533_v49 = vld [vmem:[%s4175_s13 + $0x30] sm:$0xff] }
 0x604   :  { %2555 = vpow2.f32 %v2065_v50  ;;  %v1534_v50 = vld [vmem:[%s4175_s13 + $0x38] sm:$0xff] }
 0x60a   :  { %v2550_v56 = vpop.eup %2549 }
 0x60b   :  { %v1212_v57 = vadd.f32 1.0, %v2550_v56  ;;  %v2069_v56 = vsel %vm1267_vm6, 1.0, %v4246_v24  ;;  %vm1781_vm6 = vcmp.gt.s32.totalorder %v3718_v0, 0 }
 0x60c   :  { %v2552_v1 = vpop.eup %2551 }
 0x60d   :  { %2557 = vrcp.f32 %v1212_v57  ;;  %v1213_v2 = vadd.f32 1.0, %v2552_v1  ;;  %v2554_v22 = vpop.eup %2553  ;;  %v1472_v57 = vpack.c.bf16 %v1459_v8, %v1458_v34  ;;  %v1460_v1 = vld [vmem:[%s4173_s11 + $0x30] sm:$0xff]  ;;  %v1919_v34 = vld [vmem:[%s4178_s16 + $0x88] sm:$0xff] }
 0x60e   :  { %v2556_v23 = vpop.eup %2555  ;;  %v1226_v51 = vadd.f32 1.0, %v2554_v22  ;;  %v1461_v22 = vld [vmem:[%s4173_s11 + $0x38] sm:$0xff] }
 0x60f   :  { %2559 = vrcp.f32 %v1213_v2  ;;  %v1227_v30 = vadd.f32 1.0, %v2556_v23  ;;  %v1546_v2 = vpack.c.bf16 %v1534_v50, %v1533_v49  ;;  %v1535_v23 = vld [vmem:[%s4175_s13 + $0x40] sm:$0xff] }
 0x610   :  { %2561 = vrcp.f32 %v1226_v51  ;;  %v1536_v51 = vld [vmem:[%s4175_s13 + $0x48] sm:$0xff] }
 0x611   :  { %2563 = vrcp.f32 %v1227_v30  ;;  %v1473_v30 = vpack.c.bf16 %v1461_v22, %v1460_v1  ;;  %v1920_v22 = vld [vmem:[%s4178_s16 + $0x90] sm:$0xff] }
 0x617   :  { %v2558_v40 = vpop.eup %2557 }
 0x618   :  { %v1232_v13 = vmul.f32 %v2558_v40, %v1198_v31  ;;  %v1462_v31 = vld [vmem:[%s4173_s11 + $0x40] sm:$0xff]  ;;  %v1547_v40 = vpack.c.bf16 %v1536_v51, %v1535_v23  ;;  %v1921_v23 = vld [vmem:[%s4178_s16 + $0x98] sm:$0xff] }
 0x619   :  { %v2560_v17 = vpop.eup %2559 }
 0x61a   :  { %v1234_v61 = vadd.f32 %v1232_v13, %v1116_v28  ;;  %v1233_v46 = vmul.f32 %v2560_v17, %v1201_v55  ;;  %v2562_v59 = vpop.eup %2561  ;;  %v1463_v28 = vld [vmem:[%s4173_s11 + $0x48] sm:$0xff]  ;;  %v1537_v13 = vld [vmem:[%s4175_s13 + $0x50] sm:$0xff]  ;;  %v1538_v55 = vld [vmem:[%s4175_s13 + $0x58] sm:$0xff] }
 0x61b   :  { %v2564_v16 = vpop.eup %2563  ;;  %v1238_v25 = vsub.f32 1.0, %v2562_v59  ;;  %v1474_v17 = vpack.c.bf16 %v1463_v28, %v1462_v31  ;;  %v1943_v31 = vpack.c.bf16 %v1921_v23, %v1920_v22  ;;  %v1922_v28 = vld [vmem:[%s4178_s16 + $0xa0] sm:$0xff] }
 0x61c   :  { %2565 = vtanh.f32 %v1234_v61  ;;  %v1235_v43 = vadd.f32 %v1233_v46, %v1119_v58  ;;  %v1239_v47 = vsub.f32 1.0, %v2564_v16  ;;  %v1548_v58 = vpack.c.bf16 %v1538_v55, %v1537_v13  ;;  %v1464_v61 = vld [vmem:[%s4173_s11 + $0x50] sm:$0xff]  ;;  %v1465_v46 = vld [vmem:[%s4173_s11 + $0x58] sm:$0xff]  ;;  %v1923_v13 = vld [vmem:[%s4178_s16 + $0xa8] sm:$0xff] }
 0x61d   :  { %v1240_v7 = vmul.f32 %v1238_v25, %v3656_v35  ;;  %v1543_v35 = vpack.c.bf16 %v1528_v19, %v1527_v9 }
 0x61e   :  { %2567 = vtanh.f32 %v1235_v43  ;;  %v1241_v18 = vmul.f32 %v1239_v47, %v3658_v27  ;;  %v1454_v27 = vld [vmem:[%s4173_s11] sm:$0xff]  ;;  %v1475_v43 = vpack.c.bf16 %v1465_v46, %v1464_v61  ;;  %v1469_v47 = vld [vmem:[%s4173_s11 + $0x78] sm:$0xff]  ;;  %v1924_v61 = vld [vmem:[%s4178_s16 + $0xb0] sm:$0xff] }
 0x61f   :  { %v1470_v44 = vpack.c.bf16 %v1455_v21, %v1454_v27  ;;  %v1925_v46 = vld [vmem:[%s4178_s16 + $0xb8] sm:$0xff] }
 0x626   :  { %v2566_v4 = vpop.eup %2565 }
 0x627   :  { %v1242_v29 = vmul.f32 %v2566_v4, %v2562_v59  ;;  %v1466_v59 = vld [vmem:[%s4173_s11 + $0x60] sm:$0xff]  ;;  %v1477_v4 = vpack.c.bf16 %v1469_v47, %v1468_v41  ;;  %v1928_v41 = vld [vmem:[%s4178_s16 + $0xd0] sm:$0xff]  ;;  %v1929_v47 = vld [vmem:[%s4178_s16 + $0xd8] sm:$0xff] }
 0x628   :  { %v2568_v42 = vpop.eup %2567 }
 0x629   :  { %v1243_v10 = vmul.f32 %v2568_v42, %v2564_v16  ;;  %v1244_v53 = vadd.f32 %v1242_v29, %v1240_v7  ;;  %v1467_v16 = vld [vmem:[%s4173_s11 + $0x68] sm:$0xff]  ;;  %v1539_v7 = vld [vmem:[%s4175_s13 + $0x60] sm:$0xff] }
 0x62a   :  { %v1476_v25 = vpack.c.bf16 %v1467_v16, %v1466_v59  ;;  %v1540_v29 = vld [vmem:[%s4175_s13 + $0x68] sm:$0xff]  ;;  %v1926_v59 = vld [vmem:[%s4178_s16 + $0xc0] sm:$0xff] }
 0x62b   :  { %v1245_v14 = vadd.f32 %v1243_v10, %v1241_v18  ;;  %v1549_v42 = vpack.c.bf16 %v1540_v29, %v1539_v7  ;;  %v1541_v18 = vld [vmem:[%s4175_s13 + $0x70] sm:$0xff]  ;;  %v1542_v10 = vld [vmem:[%s4175_s13 + $0x78] sm:$0xff]  ;;  %v1927_v16 = vld [vmem:[%s4178_s16 + $0xc8] sm:$0xff] }
 0x62c   :  { %v1930_v7 = vld [vmem:[%s4178_s16 + $0xe0] sm:$0xff]  ;;  %v1931_v29 = vld [vmem:[%s4178_s16 + $0xe8] sm:$0xff] }
 0x62d   :  { %v2477_v12 = vpack.c.bf16 %v1245_v14, %v1244_v53  ;;  %v1550_v53 = vpack.c.bf16 %v1542_v10, %v1541_v18  ;;  %v1932_v18 = vld [vmem:[%s4178_s16 + $0xf0] sm:$0xff]  ;;  %v1933_v10 = vld [vmem:[%s4178_s16 + $0xf8] sm:$0xff] }
 0x62f   :  { %2478 = vmatprep.subr.bf16.mxu1 %v2477_v12  ;;  %2483 = vmatpush3.bf16.msra.mxu0 %v2477_v12 }
 0x630   :  { %2480 = vmatpush3.bf16.msra.mxu1 %v2477_v12  ;;  %2398 = vmatprep.subr.bf16.mxu0 %v1543_v35 }
 0x631   :  { %2378 = vmatprep.subr.bf16.mxu1 %v4246_v24 }
 0x632   :  { %2376 = vmatmul.mubr.msk.f32.vlgmr.msra.gmra.mrb[36].mxu0 %vm392_vm1, %v2074_v32  ;;  %v1612_v32 = vmul.u32 8, %v3814_v52 }
 0x633   :  { %2366 = vmatmul.mubr.msk.f32.vlgmr.msra.gmra.mrb[20].mxu1 %vm392_vm1, %v2067_v33  ;;  %2399 = vmatpush3.bf16.msra.mxu0 %v1543_v35  ;;  %v1618_v33 = vmul.u32 8, %v1617_v63 }
 0x634   :  { %2368 = vmatprep.mubr.msk.f32.mxu1 %vm392_vm1, %v2068_v45  ;;  %2379 = vmatpush3.bf16.msra.mxu1 %v1470_v44  ;;  %vm1613_vm7 = vcmp.ge.s32.totalorder %v2928_v6, %v1612_v32  ;;  %vm1614_vm10 = vcmp.ge.s32.totalorder %v1609_v39, %v1612_v32  ;;  %v1610_v45 = vadd.s32 16, %v2928_v6  ;;  %vm1616_vm2 = vcmp.ge.s32.totalorder %v1611_v48, %v1612_v32 }
 0x635   :  { %2380 = vmatprep.subr.bf16.mxu1 %v4246_v24  ;;  %2400 = vmatprep.subr.bf16.mxu0 %v1544_v11  ;;  %vm1619_vm8 = vcmp.lt.s32.totalorder %v2928_v6, %v1618_v33  ;;  %vm1620_vm11 = vcmp.lt.s32.totalorder %v1609_v39, %v1618_v33  ;;  %vm1622_vm3 = vcmp.lt.s32.totalorder %v1611_v48, %v1618_v33 }
 0x636   :  { %vm1623_vm9 = vmand %vm1613_vm7, %vm1619_vm8  ;;  %vm1615_vm14 = vcmp.ge.s32.totalorder %v1610_v45, %v1612_v32  ;;  %vm1621_vm15 = vcmp.lt.s32.totalorder %v1610_v45, %v1618_v33  ;;  %vm1780_vm7 = vcmp.gt.s32.totalorder %v3724_v37, 0  ;;  %vm1782_vm8 = vcmp.gt.s32.totalorder %v3729_v54, 0 }
 0x637   :  { %2369 = vmatmul.mubr.msk.f32.gmra.mrb[22].mxu1 %vm392_vm1, %v2069_v56  ;;  %2401 = vmatpush3.bf16.msra.mxu0 %v1544_v11  ;;  %v2078_v44 = vsel %vm1623_vm9, 1.0, %v4246_v24  ;;  %vm3973_vm13 = vmand %vm1614_vm10, %vm1620_vm11  ;;  %vm1783_vm9 = vcmp.gt.s32.totalorder %v3736_v36, 0  ;;  %v1820_v36 = vmul.u32 8, %v2928_v6 }
 0x638   :  { %2381 = vmatpush3.bf16.msra.mxu1 %v1471_v20  ;;  %2402 = vmatprep.subr.bf16.mxu0 %v1545_v3  ;;  %vm3980_vm1 = vmand %vm1615_vm14, %vm1621_vm15  ;;  %v1918_v20 = vld [vmem:[%s4178_s16 + $0x80] sm:$0xff]  ;;  %v2079_v56 = vsel %vm3973_vm13, 1.0, %v4246_v24  ;;  %vm1828_vm13 = vcmask 261120  }
 0x639   :  { %2382 = vmatprep.subr.bf16.mxu1 %v4246_v24  ;;  %2394 = vmatprep.mubr.msk.bf16.mxu1 %vm2611_vm0, %v4246_v24  ;;  %vm3984_vm4 = vmand %vm1616_vm2, %vm1622_vm3  ;;  %vm1821_vm10 = vcmp.ge.s32.totalorder %v3814_v52, %v1820_v36 }
 0x63b   :  { %2403 = vmatpush3.bf16.msra.mxu0 %v1545_v3 }
 0x63c   :  { %2383 = vmatpush3.bf16.msra.mxu1 %v1472_v57  ;;  %2404 = vmatprep.subr.bf16.mxu0 %v1546_v2  ;;  %v1942_v57 = vpack.c.bf16 %v1919_v34, %v1918_v20 }
 0x63d   :  { %2384 = vmatprep.subr.bf16.mxu1 %v4246_v24 }
 0x63f   :  { %2405 = vmatpush3.bf16.msra.mxu0 %v1546_v2  ;;  %v2080_v2 = vsel %vm3980_vm1, 1.0, %v4246_v24 }
 0x640   :  { %2385 = vmatpush3.bf16.msra.mxu1 %v1473_v30  ;;  %2406 = vmatprep.subr.bf16.mxu0 %v1547_v40  ;;  %v2081_v30 = vsel %vm3984_vm4, 1.0, %v4246_v24 }
 0x641   :  { %2386 = vmatprep.subr.bf16.mxu1 %v4246_v24 }
 0x643   :  { %2407 = vmatpush3.bf16.msra.mxu0 %v1547_v40 }
 0x644   :  { %2387 = vmatpush3.bf16.msra.mxu1 %v1474_v17  ;;  %2408 = vmatprep.subr.bf16.mxu0 %v1548_v58 }
 0x645   :  { %2388 = vmatprep.subr.bf16.mxu1 %v4246_v24 }
 0x647   :  { %2409 = vmatpush3.bf16.msra.mxu0 %v1548_v58  ;;  %v1944_v58 = vpack.c.bf16 %v1923_v13, %v1922_v28 }
 0x648   :  { %2389 = vmatpush3.bf16.msra.mxu1 %v1475_v43  ;;  %2410 = vmatprep.subr.bf16.mxu0 %v1549_v42  ;;  %v1945_v43 = vpack.c.bf16 %v1925_v46, %v1924_v61  ;;  %v2093_v46 = vsel %vm1781_vm6, 1.0, %v4246_v24 }
 0x649   :  { %2390 = vmatprep.subr.bf16.mxu1 %v4246_v24 }
 0x64b   :  { %2411 = vmatpush3.bf16.msra.mxu0 %v1549_v42  ;;  %v1948_v42 = vpack.c.bf16 %v1931_v29, %v1930_v7 }
 0x64c   :  { %2391 = vmatpush3.bf16.msra.mxu1 %v1476_v25  ;;  %2412 = vmatprep.subr.bf16.mxu0 %v1550_v53  ;;  %v1946_v25 = vpack.c.bf16 %v1927_v16, %v1926_v59 }
 0x64d   :  { %2392 = vmatprep.subr.bf16.mxu1 %v4246_v24 }
 0x64f   :  { %2413 = vmatpush3.bf16.msra.mxu0 %v1550_v53  ;;  %v1949_v53 = vpack.c.bf16 %v1933_v10, %v1932_v18 }
 0x650   :  { %2393 = vmatpush3.bf16.msra.mxu1 %v1477_v4  ;;  %2484 = vmatprep.subr.bf16.mxu0 %v2612_v60  ;;  %v1947_v4 = vpack.c.bf16 %v1929_v47, %v1928_v41  ;;  %v2094_v47 = vsel %vm1782_vm8, 1.0, %v4246_v24 }
 0x705   :  { %v1449_v9 = vpop.f32.mrb[36].mxu0 }
 0x706   :  { %v3950_v19 = vpack.c.bf16 %v1449_v9, %v1449_v9  ;;  %v2377_v14 = vpop.f32.mrb[37].mxu0  ;;  %v3952_v15 = vpop.f32.mrb[20].mxu1  ;;  %v2077_v9 = vld [vmem:[%s4176_s14] ss:$0 sm:$0xff] }
 0x707   :  { %v3954_v35 = vpop.f32.mrb[21].mxu1 }
 0x708   :  { %2395 = vmatmul.mubr.bf16.vlgmr.msra.gmra.mrb[24].mxu1 %v3950_v19  ;;  %v1525_v12 = vpack.c.bf16 %v3952_v15, %v3954_v35 }
 0x709   :  { %2420 = vmatprep.mubr.msk.f32.mxu1 %vm1635_vm12, %v2078_v44 }
 0x70a   :  { %v3959_v27 = vpop.f32.mrb[22].mxu1  ;;  %2414 = vmatprep.mubr.bf16.mxu0 %v1525_v12 }
 0x70b   :  { %v3961_v21 = vpop.f32.mrb[23].mxu1 }
 0x70c   :  { %v1526_v26 = vpack.c.bf16 %v3959_v27, %v3961_v21 }
 0x70e   :  { %2415 = vmatmul.mubr.bf16.vlgmr.msra.gmra.mrb[40].mxu0 %v1526_v26 }
 0x70f   :  { %2434 = vmatprep.mubr.msk.f32.mxu0 %vm2611_vm0, %v4246_v24 }
 0x7db   :  { %v1519_v3 = vpop.f32.mrb[24].mxu1 }
 0x7dc   :  { %v1520_v8 = vadd.f32 %v2076_v62, %v1519_v3  ;;  %v2396_v49 = vpop.f32.mrb[25].mxu1 }
 0x7dd   :  { %v1522_v50 = vpop.f32.mrb[26].mxu1 }
 0x7de   :  { %v2397_v1 = vpop.f32.mrb[27].mxu1  ;;  %2418 = vmatprep.subr.msk.mxu1 %vm1648_vm5, %v1520_v8 }
 0x7df   :  { %2419 = vmatpush3.msk.msra.mxu1 %vm1648_vm5, %v1520_v8 }
 0x7e0   :  { %2421 = vmatmul.mubr.msk.f32.vlgmr.msra.gmra.mrb[28].mxu1 %vm1635_vm12, %v2079_v56  ;;  %2437 = vmatprep.subr.bf16.mxu1 %v4246_v24 }
 0x7e1   :  { %v2416_v51 = vpop.f32.mrb[40].mxu0  ;;  %2438 = vmatpush3.bf16.msra.mxu1 %v1942_v57  ;;  %2423 = vmatprep.mubr.msk.f32.mxu1 %vm1635_vm12, %v2080_v2  ;;  %v2091_v2 = vld [vmem:[%s4177_s15] ss:$0 sm:$0xff] }
 0x7e2   :  { %v1592_v40 = vpop.f32.mrb[41].mxu0  ;;  %2439 = vmatprep.subr.bf16.mxu1 %v4246_v24  ;;  %v1601_v38 = vadd.f32 %v2416_v51, %v2077_v9 }
 0x7e3   :  { %v2417_v55 = vpop.f32.mrb[42].mxu0  ;;  %v1593_v12 = vadd.f32 %v2077_v9, %v1592_v40 }
 0x7e4   :  { %v1595_v17 = vpop.f32.mrb[43].mxu0  ;;  %2424 = vmatmul.mubr.msk.f32.gmra.mrb[30].mxu1 %vm1635_vm12, %v2081_v30  ;;  %v1604_v39 = vadd.f32 %v2417_v55, %v2077_v9 }
 0x7e5   :  { %2440 = vmatpush3.bf16.msra.mxu1 %v1943_v31  ;;  %2453 = vmatprep.mubr.msk.bf16.mxu1 %vm2611_vm0, %v4246_v24  ;;  %v1596_v14 = vadd.f32 %v2077_v9, %v1595_v17 }
 0x7e6   :  { %2441 = vmatprep.subr.bf16.mxu1 %v4246_v24 }
 0x7e9   :  { %2442 = vmatpush3.bf16.msra.mxu1 %v1944_v58 }
 0x7ea   :  { %2443 = vmatprep.subr.bf16.mxu1 %v4246_v24 }
 0x7ed   :  { %2444 = vmatpush3.bf16.msra.mxu1 %v1945_v43  ;;  %v2092_v43 = vsel %vm1780_vm7, 1.0, %v4246_v24 }
 0x7ee   :  { %2445 = vmatprep.subr.bf16.mxu1 %v4246_v24 }
 0x7f1   :  { %2446 = vmatpush3.bf16.msra.mxu1 %v1946_v25 }
 0x7f2   :  { %2447 = vmatprep.subr.bf16.mxu1 %v4246_v24 }
 0x7f5   :  { %2448 = vmatpush3.bf16.msra.mxu1 %v1947_v4  ;;  %v2095_v4 = vsel %vm1783_vm9, 1.0, %v4246_v24 }
 0x7f6   :  { %2449 = vmatprep.subr.bf16.mxu1 %v4246_v24 }
 0x7f9   :  { %2450 = vmatpush3.bf16.msra.mxu1 %v1948_v42  ;;  %v1822_v42 = vadd.s32 1, %v2928_v6  ;;  %v1902_v6 = vld [vmem:[%s4178_s16] sm:$0xff] }
 0x7fa   :  { %2451 = vmatprep.subr.bf16.mxu1 %v4246_v24 }
 0x7fb   :  { %v1823_v18 = vmul.u32 8, %v1822_v42 }
 0x7fd   :  { %2452 = vmatpush3.bf16.msra.mxu1 %v1949_v53  ;;  %vm1824_vm11 = vcmp.lt.s32.totalorder %v3814_v52, %v1823_v18 }
 0x7fe   :  { %vm1825_vm12 = vmand %vm1821_vm10, %vm1824_vm11 }
 0x7ff   :  { %v2096_v52 = vsel %vm1825_vm12, 1.0, %v4246_v24 }
 0x800   :  { %2454 = vmatmul.mubr.bf16.vlgmr.msra.gmra.mrb[32].mxu1 %v3950_v19 }
 0x8b3   :  { %v2422_v26 = vpop.f32.mrb[28].mxu1 }
 0x8b4   :  { %v1724_v63 = vadd.f32 %v2422_v26, %v1596_v14  ;;  %v1718_v32 = vpop.f32.mrb[29].mxu1 }
 0x8b5   :  { %v1719_v33 = vadd.f32 %v1718_v32, %v1593_v12 }
 0x8b6   :  { %v2088_v44 = vmul.f32 -1.442695, %v1724_v63 }
 0x8b7   :  { %v2087_v45 = vmul.f32 -1.442695, %v1719_v33  ;;  %v2425_v48 = vpop.f32.mrb[30].mxu1 }
 0x8b8   :  { %2569 = vpow2.f32 %v2088_v44  ;;  %v1734_v11 = vadd.f32 %v2425_v48, %v1604_v39  ;;  %v1728_v5 = vpop.f32.mrb[31].mxu1  ;;  %v1906_v39 = vld [vmem:[%s4178_s16 + $0x20] sm:$0xff]  ;;  %v1907_v44 = vld [vmem:[%s4178_s16 + $0x28] sm:$0xff]  ;;  %v1909_v48 = vld [vmem:[%s4178_s16 + $0x38] sm:$0xff] }
 0x8b9   :  { %2571 = vpow2.f32 %v2087_v45  ;;  %v1729_v19 = vadd.f32 %v1728_v5, %v1601_v38  ;;  %v1936_v38 = vpack.c.bf16 %v1907_v44, %v1906_v39  ;;  %v1908_v45 = vld [vmem:[%s4178_s16 + $0x30] sm:$0xff]  ;;  %v1910_v5 = vld [vmem:[%s4178_s16 + $0x40] sm:$0xff] }
 0x8ba   :  { %v2090_v62 = vmul.f32 -1.442695, %v1734_v11  ;;  %v1937_v11 = vpack.c.bf16 %v1909_v48, %v1908_v45 }
 0x8bb   :  { %v2089_v20 = vmul.f32 -1.442695, %v1729_v19  ;;  %v1911_v19 = vld [vmem:[%s4178_s16 + $0x48] sm:$0xff] }
 0x8bc   :  { %2573 = vpow2.f32 %v2090_v62  ;;  %v1938_v62 = vpack.c.bf16 %v1911_v19, %v1910_v5 }
 0x8bd   :  { %2575 = vpow2.f32 %v2089_v20  ;;  %v1912_v20 = vld [vmem:[%s4178_s16 + $0x50] sm:$0xff] }
 0x8c2   :  { %v2570_v34 = vpop.eup %2569 }
 0x8c3   :  { %v2572_v3 = vpop.eup %2571  ;;  %v1750_v8 = vadd.f32 1.0, %v2570_v34  ;;  %v1913_v34 = vld [vmem:[%s4178_s16 + $0x58] sm:$0xff] }
 0x8c4   :  { %v1749_v49 = vadd.f32 1.0, %v2572_v3  ;;  %v1939_v3 = vpack.c.bf16 %v1913_v34, %v1912_v20 }
 0x8c5   :  { %2577 = vrcp.f32 %v1750_v8  ;;  %v1914_v8 = vld [vmem:[%s4178_s16 + $0x60] sm:$0xff] }
 0x8c6   :  { %v2574_v50 = vpop.eup %2573  ;;  %2579 = vrcp.f32 %v1749_v49  ;;  %v1915_v49 = vld [vmem:[%s4178_s16 + $0x68] sm:$0xff] }
 0x8c7   :  { %v2576_v56 = vpop.eup %2575  ;;  %v1752_v57 = vadd.f32 1.0, %v2574_v50  ;;  %v1940_v50 = vpack.c.bf16 %v1915_v49, %v1914_v8 }
 0x8c8   :  { %v1751_v1 = vadd.f32 1.0, %v2576_v56  ;;  %v1916_v56 = vld [vmem:[%s4178_s16 + $0x70] sm:$0xff] }
 0x8c9   :  { %2581 = vrcp.f32 %v1752_v57  ;;  %v1917_v57 = vld [vmem:[%s4178_s16 + $0x78] sm:$0xff] }
 0x8ca   :  { %2583 = vrcp.f32 %v1751_v1  ;;  %v1941_v1 = vpack.c.bf16 %v1917_v57, %v1916_v56 }
 0x8cf   :  { %v2578_v22 = vpop.eup %2577 }
 0x8d0   :  { %v2580_v23 = vpop.eup %2579  ;;  %v1769_v51 = vmul.f32 %v2578_v22, %v2091_v2 }
 0x8d1   :  { %v1768_v30 = vmul.f32 %v2580_v23, %v2091_v2 }
 0x8d2   :  { %1774 = vadd.xlane.f32.xlu0 %v1769_v51 }
 0x8d3   :  { %v2582_v31 = vpop.eup %2581  ;;  %v4068_v40 = vpop.f32.mrb[32].mxu1  ;;  %1772 = vadd.xlane.f32.xlu1 %v1768_v30  ;;  %v2098_v30 = vld [vmem:[%s4179_s17] ss:$0 sm:$0xff] }
 0x8d4   :  { %v2584_v28 = vpop.eup %2583  ;;  %v2455_v13 = vpop.f32.mrb[33].mxu1  ;;  %v1771_v55 = vmul.f32 %v2582_v31, %v2091_v2 }
 0x8d5   :  { %v1988_v17 = vpop.f32.mrb[34].mxu1  ;;  %v1770_v58 = vmul.f32 %v2584_v28, %v2091_v2 }
 0x8d6   :  { %v2456_v61 = vpop.f32.mrb[35].mxu1 }
 0x8d7   :  { %1776 = vadd.xlane.f32.xlu0 %v1770_v58  ;;  %1778 = vadd.xlane.f32.xlu1 %v1771_v55 }
 0x95f   :  { %v1775_v59 = vpop.xlane.xlu0 %1774 }
 0x960   :  { %v1793_v16 = vmul.f32 %v2093_v46, %v1775_v59  ;;  %v1773_v25 = vpop.xlane.xlu1 %1772 }
 0x961   :  { %v1792_v41 = vmul.f32 %v2092_v43, %v1773_v25 }
 0x962   :  { %1803 = vperm.xlu1 %2528, %v1793_v16  }
 0x963   :  { %1798 = vperm.xlu0 %2527, %v1792_v41  }
 0x964   :  { %v1777_v0 = vpop.xlane.xlu0 %1776  ;;  %v1779_v37 = vpop.xlane.xlu1 %1778 }
 0x965   :  { %v1794_v7 = vmul.f32 %v2094_v47, %v1777_v0  ;;  %v1795_v29 = vmul.f32 %v2095_v4, %v1779_v37 }
 0x967   :  { %1808 = vperm.xlu1 %2528, %v1794_v7   ;;  %1813 = vperm.xlu0 %2527, %v1795_v29  }
 0x9e1   :  { %v1804_v54 = vpop.permute.xlu1 %1803 }
 0x9e2   :  { %v1817_v10 = vmul.f32 %v3952_v15, %v1804_v54  ;;  %v1799_v53 = vpop.permute.xlu0 %1798  ;;  %v1903_v15 = vld [vmem:[%s4178_s16 + $0x8] sm:$0xff] }
 0x9e3   :  { %v1816_v9 = vmul.f32 %v1799_v53, %v3954_v35 }
 0x9e5   :  { %v2485_v14 = vpack.c.bf16 %v1817_v10, %v1816_v9 }
 0x9e6   :  { %v1814_v12 = vpop.permute.xlu0 %1813  ;;  %v1809_v26 = vpop.permute.xlu1 %1808 }
 0x9e7   :  { %v1819_v63 = vmul.f32 %v3959_v27, %v1814_v12  ;;  %v1818_v32 = vmul.f32 %v1809_v26, %v3961_v21  ;;  %2486 = vmatpush3.bf16.msra.mxu0 %v2485_v14  ;;  %v1934_v27 = vpack.c.bf16 %v1903_v15, %v1902_v6  ;;  %v1905_v21 = vld [vmem:[%s4178_s16 + $0x18] sm:$0xff] }
 0x9e8   :  { %2487 = vmatprep.subr.bf16.mxu0 %v2612_v60  ;;  %v1904_v60 = vld [vmem:[%s4178_s16 + $0x10] sm:$0xff]  ;;  %s2585_s16 = scalar_lea.vmem %s2047_s9, 64 }
 0x9e9   :  { %v2488_v35 = vpack.c.bf16 %v1819_v63, %v1818_v32  ;;  %v1935_v33 = vpack.c.bf16 %v1905_v21, %v1904_v60  ;;  %p2586_p0 = scmp.ne.s32.totalorder %s2047_s9, %s2585_s16  ;;  %p2591_p2 = scmp.lt.s32.totalorder %s2585_s16, %s2585_s16 }
 0x9eb   :  { %2489 = vmatpush3.bf16.msra.mxu0 %v2488_v35  ;;  %p2592_p3 = por %p2591_p2, %p2590_p1 }
 0x9ec   :  { %2457 = vmatprep.subr.bf16.mxu0 %v4246_v24 }
 0x9ed   :  { %p2593_p4 = pnand %p2592_p3, %p2586_p0 }
 0x9ee   :  { %2435 = vmatmul.mubr.msk.f32.vlgmr.msra.gmra.mrb[38].mxu0 %vm1828_vm13, %v2096_v52 }
 0x9ef   :  { %2458 = vmatpush3.bf16.msra.mxu0 %v1934_v27  ;;  %2473 = vmatprep.mubr.msk.bf16.mxu0 %vm2611_vm0, %v4246_v24 }
 0x9f0   :  { %2459 = vmatprep.subr.bf16.mxu0 %v4246_v24 }
 0x9f3   :  { %2460 = vmatpush3.bf16.msra.mxu0 %v1935_v33 }
 0x9f4   :  { %2461 = vmatprep.subr.bf16.mxu0 %v4246_v24 }
 0x9f7   :  { %2462 = vmatpush3.bf16.msra.mxu0 %v1936_v38 }
 0x9f8   :  { %2463 = vmatprep.subr.bf16.mxu0 %v4246_v24 }
 0x9fb   :  { %2464 = vmatpush3.bf16.msra.mxu0 %v1937_v11 }
 0x9fc   :  { %2465 = vmatprep.subr.bf16.mxu0 %v4246_v24 }
 0x9ff   :  { %2466 = vmatpush3.bf16.msra.mxu0 %v1938_v62 }
 0xa00   :  { %2467 = vmatprep.subr.bf16.mxu0 %v4246_v24 }
 0xa03   :  { %2468 = vmatpush3.bf16.msra.mxu0 %v1939_v3 }
 0xa04   :  { %2469 = vmatprep.subr.bf16.mxu0 %v4246_v24 }
 0xa07   :  { %2470 = vmatpush3.bf16.msra.mxu0 %v1940_v50 }
 0xa08   :  { %2471 = vmatprep.subr.bf16.mxu0 %v4246_v24 }
 0xa0b   :  { %2472 = vmatpush3.bf16.msra.mxu0 %v1941_v1 }
 0xac1   :  { %v1898_v2 = vpop.f32.mrb[38].mxu0 }
 0xac2   :  { %v1950_v22 = vpack.c.bf16 %v1898_v2, %v1898_v2  ;;  %v2436_v23 = vpop.f32.mrb[39].mxu0 }
 0xac4   :  { %2474 = vmatmul.mubr.bf16.vlgmr.msra.gmra.mrb[44].mxu0 %v1950_v22 }
 0xb97   :  { %v2025_v51 = vpop.f32.mrb[44].mxu0 }
 0xb98   :  { %v2026_v24 = vadd.f32 %v2025_v51, %v4068_v40  ;;  %v2475_v31 = vpop.f32.mrb[45].mxu0 }
 0xb99   :  { %v2028_v28 = vpop.f32.mrb[46].mxu0 }
 0xb9a   :  { %v2476_v13 = vpop.f32.mrb[47].mxu0  ;;  %v2038_v55 = vadd.f32 %v2098_v30, %v2026_v24 }
 0xb9c   :  { %2039 = vst [vmem:[#allocation2] sm:$0xf] %v2038_v55 }
 0xb9d   :  { %2596 = shalt.err (!%p2593_p4)
}
 0xb9e   :  { %s2597_s17 = scalar_lea.hbm %s4180_s18, 64 }
 0xb9f   :  { %p2598_p5 = scmp.ne.s32.totalorder %s4180_s18, %s2597_s17  ;;  %p2601_p6 = scmp.lt.u32.totalorder %s2597_s17, %s4180_s18 }
 0xba1   :  { %p2603_p7 = pnand %p2601_p6, %p2598_p5 }
 0xba3   :  { %2606 = shalt.err (!%p2603_p7)
}
 0xba4   :  { %2049 = dma.vmem_to_hbm [thread:$0]  %s2047_s9, 64, %s4180_s18, [#allocation3]  }
 0xba5   :  { %2607 = dma.done.wait [#allocation3], 64  }
 0xba6   :  { %2608 = vsyncadd [#allocation3], 4294967232 }
 0xba7   :  { %2053 = vsyncpa [#allocation3], 1 }

</bundles_post_ra>
